<compile_context>
chip_gen: v5e
topology: v5e:2x2
jax: 0.10.0
libtpu: 0.0.40
codegen_flags: <defaults>
</compile_context>

<pallas_src>
import jax
import jax.numpy as jnp
from jax.experimental import pallas as pl
from jax.experimental.pallas import tpu as pltpu

HIDDEN = 64      # logical hidden width (matches nn.Linear(obs_dim, 64))
HP = 128         # padded hidden width (lane-dense)
AP = 128         # padded action width (lane-dense)
TB_CAP = 2048    # max rows per grid step (keeps VMEM tiny on every generation)


def pi_network_kernel(obs_ref, w1_ref, b1_ref, w2_ref, b2_ref, w3_ref, b3_ref,
                      out_ref):
    # fc1 + tanh  (bf16 MXU inputs, f32 accumulate, f32 elementwise)
    x = obs_ref[...].astype(jnp.bfloat16)
    h1 = jnp.tanh(
        jnp.dot(x, w1_ref[...], preferred_element_type=jnp.float32)
        + b1_ref[...]
    )
    # fc2 + tanh
    h2 = jnp.tanh(
        jnp.dot(h1.astype(jnp.bfloat16), w2_ref[...],
                preferred_element_type=jnp.float32)
        + b2_ref[...]
    )
    # fc3 with the action rescale pre-folded into w3'/b3'.
    # Store bf16: halves the dominant HBM output stream (and vst count on v5e).
    out_ref[...] = (
        jnp.dot(h2.astype(jnp.bfloat16), w3_ref[...],
                preferred_element_type=jnp.float32)
        + b3_ref[...]
    ).astype(jnp.bfloat16)


def fold_and_pad_params(params, upper_bound, lower_bound):
    """Fold the action rescale into fc3 and zero-pad lane dims to 128.

    params: (w1[obs,64], b1[64], w2[64,64], b2[64], w3[64,act], b3[act]) f32,
            weights stored [in, out] (i.e. PyTorch W transposed).
    Returns bf16 padded weights + f32 padded biases for the kernel.
    """
    w1, b1, w2, b2, w3, b3 = params
    obs_dim = w1.shape[0]
    act_dim = w3.shape[1]

    ub = jnp.asarray(upper_bound, jnp.float32).reshape(act_dim)
    lb = jnp.asarray(lower_bound, jnp.float32).reshape(act_dim)
    scale = (ub - lb) * 0.5                       # per-output-column scale
    w3s = w3 * scale[None, :]                     # [64, act]
    b3s = (b3 + 1.0) * scale + lb                 # [act]

    def pad2(a, rows, cols):
        return jnp.pad(a, ((0, rows - a.shape[0]), (0, cols - a.shape[1])))

    w1p = pad2(w1, obs_dim, HP).astype(jnp.bfloat16)
    w2p = pad2(w2, HP, HP).astype(jnp.bfloat16)
    w3p = pad2(w3s, HP, AP).astype(jnp.bfloat16)
    b1p = pad2(b1.reshape(1, -1), 1, HP).astype(jnp.float32)
    b2p = pad2(b2.reshape(1, -1), 1, HP).astype(jnp.float32)
    b3p = pad2(b3s.reshape(1, -1), 1, AP).astype(jnp.float32)
    return (w1p, b1p, w2p, b2p, w3p, b3p)


def _choose_batch_tiling(B, tb_cap=TB_CAP):
    """Pick (tb, n_tiles, Bp): tb is a multiple of 128, as large as the VMEM
    cap allows.  Small batches get a single grid step (minimum per-step
    overhead; optimal on 1-TC v5e/v6e); bigger batches get >=2 tiles so the
    "parallel" axis spans both TensorCores on v7x."""
    Bp = max(128, ((B + 127) // 128) * 128)
    if Bp <= 256:
        n_tiles = 1
    else:
        n_tiles = max(2, (Bp + tb_cap - 1) // tb_cap)
    tb = ((Bp // 128 + n_tiles - 1) // n_tiles) * 128
    return tb, n_tiles, n_tiles * tb


def _build_call(tb, n_tiles, Bp, obs_dim, single_buffer_weights):
    const = lambda i: (0, 0)        # weights/biases: resident across grid steps
    batched = lambda i: (i, 0)      # obs/out: tiled over the batch axis

    if single_buffer_weights:
        # Constant block index -> second pipeline buffer is dead VMEM; drop it.
        wspec = lambda shape: pl.BlockSpec(shape, const,
                                           pipeline_mode=pl.Buffered(1))
    else:
        wspec = lambda shape: pl.BlockSpec(shape, const)

    flops = 2 * Bp * (obs_dim * HP + HP * HP + HP * AP)
    transcendentals = 2 * Bp * HP
    bytes_accessed = (
        Bp * obs_dim * 4 + Bp * AP * 2                       # f32 obs in, bf16 out
        + (obs_dim * HP + HP * HP + HP * AP) * 2             # bf16 weights
        + (2 * HP + AP) * 4                                  # f32 biases
    )

    return pl.pallas_call(
        pi_network_kernel,
        out_shape=jax.ShapeDtypeStruct((Bp, AP), jnp.bfloat16),
        grid=(n_tiles,),
        in_specs=[
            pl.BlockSpec((tb, obs_dim), batched),
            wspec((obs_dim, HP)),
            wspec((1, HP)),
            wspec((HP, HP)),
            wspec((1, HP)),
            wspec((HP, AP)),
            wspec((1, AP)),
        ],
        out_specs=pl.BlockSpec((tb, AP), batched),
        compiler_params=pltpu.CompilerParams(
            dimension_semantics=("parallel",)),
        cost_estimate=pl.CostEstimate(
            flops=flops,
            transcendentals=transcendentals,
            bytes_accessed=bytes_accessed),
    )


def pi_network_forward(obs, padded_params, act_dim):
    """obs: [B, obs_dim] f32. Returns action: [B, act_dim] f32."""
    w1, b1, w2, b2, w3, b3 = padded_params
    B, obs_dim = obs.shape

    tb, n_tiles, Bp = _choose_batch_tiling(B)
    obs_p = jnp.pad(obs, ((0, Bp - B), (0, 0))) if Bp != B else obs

    try:
        call = _build_call(tb, n_tiles, Bp, obs_dim, single_buffer_weights=True)
        out_p = call(obs_p, w1, b1, w2, b2, w3, b3)
    except Exception:
        # Fallback: identical kernel with default (double-buffered) weight
        # specs — the configuration previously verified to compile clean.
        call = _build_call(tb, n_tiles, Bp, obs_dim, single_buffer_weights=False)
        out_p = call(obs_p, w1, b1, w2, b2, w3, b3)

    # TODO(synk): for very large batches, pack 32x4 actions into one 128-lane
    # row in the kernel epilogue to avoid the 32x-inflated padded output write.
    return out_p[:B, :act_dim].astype(jnp.float32)


def init_params(key, obs_dim, action_dim, hidden=HIDDEN):
    """Deterministic synthetic parameters (PyTorch-like uniform fan-in init).

    Weights stored [in_features, out_features] so forward is x @ W + b.
    """
    keys = jax.random.split(key, 6)

    def linear(kw, kb, fan_in, fan_out):
        bound = 1.0 / jnp.sqrt(fan_in)
        w = jax.random.uniform(kw, (fan_in, fan_out), jnp.float32, -bound, bound)
        b = jax.random.uniform(kb, (fan_out,), jnp.float32, -bound, bound)
        return w, b

    w1, b1 = linear(keys[0], keys[1], obs_dim, hidden)
    w2, b2 = linear(keys[2], keys[3], hidden, hidden)
    w3, b3 = linear(keys[4], keys[5], hidden, action_dim)
    return (w1, b1, w2, b2, w3, b3)


def reference_forward(obs, params, upper_bound, lower_bound):
    """Pure-JAX f32 reference of the PyTorch forward for validation."""
    w1, b1, w2, b2, w3, b3 = params
    y = jnp.tanh(obs @ w1 + b1)
    y = jnp.tanh(y @ w2 + b2)
    a = y @ w3 + b3
    ub = jnp.asarray(upper_bound, jnp.float32).reshape(1, -1)
    lb = jnp.asarray(lower_bound, jnp.float32).reshape(1, -1)
    return (a + 1.0) * (ub - lb) / 2.0 + lb


if __name__ == "__main__":
    B = 256        # batch of observations (amortizes per-call overhead)
    OBS_DIM = 8    # obs_dim
    ACT_DIM = 4    # action_dim

    key = jax.random.PRNGKey(0)
    k_obs, k_params = jax.random.split(key)

    obs = jax.random.normal(k_obs, (B, OBS_DIM), dtype=jnp.float32)
    params = init_params(k_params, OBS_DIM, ACT_DIM)

    upper_bound = jnp.array([1.0, 2.0, 0.5, 3.0], dtype=jnp.float32)
    lower_bound = jnp.array([-1.0, -2.0, -0.5, 0.0], dtype=jnp.float32)

    padded_params = fold_and_pad_params(params, upper_bound, lower_bound)

    action = pi_network_forward(obs, padded_params, ACT_DIM)
    action = jax.block_until_ready(action)

    ref = reference_forward(obs, params, upper_bound, lower_bound)
    assert action.shape == (B, ACT_DIM)
    # bf16 MXU inputs + bf16 output store (f32 accumulation) -> relaxed
    # tolerance vs f32 reference.
    assert jnp.allclose(action, ref, atol=5e-2, rtol=5e-2), (
        float(jnp.max(jnp.abs(action - ref))))

    print("KERNEL_OK")
</pallas_src>

<mosaic_0001>
module attributes {stable_mosaic.version = 11 : i64} {
  func.func @pi_network_kernel(%arg0: i32, %arg1: memref<256x8xf32, #tpu.memory_space<vmem>>, %arg2: memref<8x128xbf16, #tpu.memory_space<vmem>>, %arg3: memref<1x128xf32, #tpu.memory_space<vmem>>, %arg4: memref<128x128xbf16, #tpu.memory_space<vmem>>, %arg5: memref<1x128xf32, #tpu.memory_space<vmem>>, %arg6: memref<128x128xbf16, #tpu.memory_space<vmem>>, %arg7: memref<1x128xf32, #tpu.memory_space<vmem>>, %arg8: memref<256x128xbf16, #tpu.memory_space<vmem>>) attributes {dimension_semantics = [#tpu.dimension_semantics<parallel>], iteration_bounds = array<i64: 1>, scalar_prefetch = 0 : i64, scratch_operands = 0 : i64, tpu.core_type = #tpu.core_type<tc>, window_params = [{transform_indices = @transform_0, window_bounds = array<i64: 256, 8>}, {pipeline_mode = #tpu.pipeline_mode<synchronous>, transform_indices = @transform_1, window_bounds = array<i64: 8, 128>}, {pipeline_mode = #tpu.pipeline_mode<synchronous>, transform_indices = @transform_2, window_bounds = array<i64: 1, 128>}, {pipeline_mode = #tpu.pipeline_mode<synchronous>, transform_indices = @transform_3, window_bounds = array<i64: 128, 128>}, {pipeline_mode = #tpu.pipeline_mode<synchronous>, transform_indices = @transform_4, window_bounds = array<i64: 1, 128>}, {pipeline_mode = #tpu.pipeline_mode<synchronous>, transform_indices = @transform_5, window_bounds = array<i64: 128, 128>}, {pipeline_mode = #tpu.pipeline_mode<synchronous>, transform_indices = @transform_6, window_bounds = array<i64: 1, 128>}, {transform_indices = @transform_7, window_bounds = array<i64: 256, 128>}]} {
    %c0 = arith.constant 0 : index
    %c0_0 = arith.constant 0 : index
    %0 = vector.load %arg1[%c0, %c0_0] : memref<256x8xf32, #tpu.memory_space<vmem>>, vector<256x8xf32>
    %1 = arith.truncf %0 : vector<256x8xf32> to vector<256x8xbf16>
    %c0_1 = arith.constant 0 : index
    %c0_2 = arith.constant 0 : index
    %2 = vector.load %arg2[%c0_1, %c0_2] : memref<8x128xbf16, #tpu.memory_space<vmem>>, vector<8x128xbf16>
    %cst = arith.constant dense<0.000000e+00> : vector<256x128xf32>
    %3 = tpu.matmul %1, %2, %cst {dimension_numbers = #tpu.dot_dimension_numbers<[1], [0], [0], [1], [0, 0, 1, 1], [], []>} : vector<256x8xbf16>, vector<8x128xbf16>, vector<256x128xf32> -> vector<256x128xf32>
    %c0_3 = arith.constant 0 : index
    %c0_4 = arith.constant 0 : index
    %4 = vector.load %arg3[%c0_3, %c0_4] : memref<1x128xf32, #tpu.memory_space<vmem>>, vector<1x128xf32>
    %5 = vector.broadcast %4 : vector<1x128xf32> to vector<256x128xf32>
    %6 = arith.addf %3, %5 : vector<256x128xf32>
    %7 = math.tanh %6 : vector<256x128xf32>
    %8 = arith.truncf %7 : vector<256x128xf32> to vector<256x128xbf16>
    %c0_5 = arith.constant 0 : index
    %c0_6 = arith.constant 0 : index
    %9 = vector.load %arg4[%c0_5, %c0_6] : memref<128x128xbf16, #tpu.memory_space<vmem>>, vector<128x128xbf16>
    %cst_7 = arith.constant dense<0.000000e+00> : vector<256x128xf32>
    %10 = tpu.matmul %8, %9, %cst_7 {dimension_numbers = #tpu.dot_dimension_numbers<[1], [0], [0], [1], [0, 0, 1, 1], [], []>} : vector<256x128xbf16>, vector<128x128xbf16>, vector<256x128xf32> -> vector<256x128xf32>
    %c0_8 = arith.constant 0 : index
    %c0_9 = arith.constant 0 : index
    %11 = vector.load %arg5[%c0_8, %c0_9] : memref<1x128xf32, #tpu.memory_space<vmem>>, vector<1x128xf32>
    %12 = vector.broadcast %11 : vector<1x128xf32> to vector<256x128xf32>
    %13 = arith.addf %10, %12 : vector<256x128xf32>
    %14 = math.tanh %13 : vector<256x128xf32>
    %15 = arith.truncf %14 : vector<256x128xf32> to vector<256x128xbf16>
    %c0_10 = arith.constant 0 : index
    %c0_11 = arith.constant 0 : index
    %16 = vector.load %arg6[%c0_10, %c0_11] : memref<128x128xbf16, #tpu.memory_space<vmem>>, vector<128x128xbf16>
    %cst_12 = arith.constant dense<0.000000e+00> : vector<256x128xf32>
    %17 = tpu.matmul %15, %16, %cst_12 {dimension_numbers = #tpu.dot_dimension_numbers<[1], [0], [0], [1], [0, 0, 1, 1], [], []>} : vector<256x128xbf16>, vector<128x128xbf16>, vector<256x128xf32> -> vector<256x128xf32>
    %c0_13 = arith.constant 0 : index
    %c0_14 = arith.constant 0 : index
    %18 = vector.load %arg7[%c0_13, %c0_14] : memref<1x128xf32, #tpu.memory_space<vmem>>, vector<1x128xf32>
    %19 = vector.broadcast %18 : vector<1x128xf32> to vector<256x128xf32>
    %20 = arith.addf %17, %19 : vector<256x128xf32>
    %21 = arith.truncf %20 : vector<256x128xf32> to vector<256x128xbf16>
    %c0_15 = arith.constant 0 : index
    %c0_16 = arith.constant 0 : index
    %22 = vector.load %arg8[%c0_15, %c0_16] : memref<256x128xbf16, #tpu.memory_space<vmem>>, vector<256x128xbf16>
    tpu.vector_store %arg8[%c0_15, %c0_16], %21 {strides = array<i32>} : memref<256x128xbf16, #tpu.memory_space<vmem>>, vector<256x128xbf16>,
    return
  }
  func.func @transform_0(%arg0: i32) -> (i32, i32) {
    %c0_i32 = arith.constant 0 : i32
    %c0_i32_0 = arith.constant 0 : i32
    return %arg0, %c0_i32 : i32, i32
  }
  func.func @transform_1(%arg0: i32) -> (i32, i32) {
    %c0_i32 = arith.constant 0 : i32
    %c0_i32_0 = arith.constant 0 : i32
    %c0_i32_1 = arith.constant 0 : i32
    return %c0_i32, %c0_i32_0 : i32, i32
  }
  func.func @transform_2(%arg0: i32) -> (i32, i32) {
    %c0_i32 = arith.constant 0 : i32
    %c0_i32_0 = arith.constant 0 : i32
    %c0_i32_1 = arith.constant 0 : i32
    return %c0_i32, %c0_i32_0 : i32, i32
  }
  func.func @transform_3(%arg0: i32) -> (i32, i32) {
    %c0_i32 = arith.constant 0 : i32
    %c0_i32_0 = arith.constant 0 : i32
    %c0_i32_1 = arith.constant 0 : i32
    return %c0_i32, %c0_i32_0 : i32, i32
  }
  func.func @transform_4(%arg0: i32) -> (i32, i32) {
    %c0_i32 = arith.constant 0 : i32
    %c0_i32_0 = arith.constant 0 : i32
    %c0_i32_1 = arith.constant 0 : i32
    return %c0_i32, %c0_i32_0 : i32, i32
  }
  func.func @transform_5(%arg0: i32) -> (i32, i32) {
    %c0_i32 = arith.constant 0 : i32
    %c0_i32_0 = arith.constant 0 : i32
    %c0_i32_1 = arith.constant 0 : i32
    return %c0_i32, %c0_i32_0 : i32, i32
  }
  func.func @transform_6(%arg0: i32) -> (i32, i32) {
    %c0_i32 = arith.constant 0 : i32
    %c0_i32_0 = arith.constant 0 : i32
    %c0_i32_1 = arith.constant 0 : i32
    return %c0_i32, %c0_i32_0 : i32, i32
  }
  func.func @transform_7(%arg0: i32) -> (i32, i32) {
    %c0_i32 = arith.constant 0 : i32
    %c0_i32_0 = arith.constant 0 : i32
    return %arg0, %c0_i32 : i32, i32
  }
}

module attributes {stable_mosaic.version = 11 : i64} {
  func.func @pi_network_kernel(%arg0: i32, %arg1: memref<256x8xf32, #tpu.memory_space<vmem>>, %arg2: memref<8x128xbf16, #tpu.memory_space<vmem>>, %arg3: memref<1x128xf32, #tpu.memory_space<vmem>>, %arg4: memref<128x128xbf16, #tpu.memory_space<vmem>>, %arg5: memref<1x128xf32, #tpu.memory_space<vmem>>, %arg6: memref<128x128xbf16, #tpu.memory_space<vmem>>, %arg7: memref<1x128xf32, #tpu.memory_space<vmem>>, %arg8: memref<256x128xbf16, #tpu.memory_space<vmem>>) attributes {dimension_semantics = [#tpu.dimension_semantics<parallel>], iteration_bounds = array<i64: 1>, scalar_prefetch = 0 : i64, scratch_operands = 0 : i64, tpu.core_type = #tpu.core_type<tc>, window_params = [{transform_indices = @transform_0, window_bounds = array<i64: 256, 8>}, {pipeline_mode = #tpu.pipeline_mode<synchronous>, transform_indices = @transform_1, window_bounds = array<i64: 8, 128>}, {pipeline_mode = #tpu.pipeline_mode<synchronous>, transform_indices = @transform_2, window_bounds = array<i64: 1, 128>}, {pipeline_mode = #tpu.pipeline_mode<synchronous>, transform_indices = @transform_3, window_bounds = array<i64: 128, 128>}, {pipeline_mode = #tpu.pipeline_mode<synchronous>, transform_indices = @transform_4, window_bounds = array<i64: 1, 128>}, {pipeline_mode = #tpu.pipeline_mode<synchronous>, transform_indices = @transform_5, window_bounds = array<i64: 128, 128>}, {pipeline_mode = #tpu.pipeline_mode<synchronous>, transform_indices = @transform_6, window_bounds = array<i64: 1, 128>}, {transform_indices = @transform_7, window_bounds = array<i64: 256, 128>}]} {
    %c0 = arith.constant 0 : index
    %c0_0 = arith.constant 0 : index
    %0 = vector.load %arg1[%c0, %c0_0] : memref<256x8xf32, #tpu.memory_space<vmem>>, vector<256x8xf32>
    %1 = arith.truncf %0 : vector<256x8xf32> to vector<256x8xbf16>
    %c0_1 = arith.constant 0 : index
    %c0_2 = arith.constant 0 : index
    %2 = vector.load %arg2[%c0_1, %c0_2] : memref<8x128xbf16, #tpu.memory_space<vmem>>, vector<8x128xbf16>
    %cst = arith.constant dense<0.000000e+00> : vector<256x128xf32>
    %3 = tpu.matmul %1, %2, %cst {dimension_numbers = #tpu.dot_dimension_numbers<[1], [0], [0], [1], [0, 0, 1, 1], [], []>} : vector<256x8xbf16>, vector<8x128xbf16>, vector<256x128xf32> -> vector<256x128xf32>
    %c0_3 = arith.constant 0 : index
    %c0_4 = arith.constant 0 : index
    %4 = vector.load %arg3[%c0_3, %c0_4] : memref<1x128xf32, #tpu.memory_space<vmem>>, vector<1x128xf32>
    %5 = vector.broadcast %4 : vector<1x128xf32> to vector<256x128xf32>
    %6 = arith.addf %3, %5 : vector<256x128xf32>
    %7 = math.tanh %6 : vector<256x128xf32>
    %8 = arith.truncf %7 : vector<256x128xf32> to vector<256x128xbf16>
    %c0_5 = arith.constant 0 : index
    %c0_6 = arith.constant 0 : index
    %9 = vector.load %arg4[%c0_5, %c0_6] : memref<128x128xbf16, #tpu.memory_space<vmem>>, vector<128x128xbf16>
    %cst_7 = arith.constant dense<0.000000e+00> : vector<256x128xf32>
    %10 = tpu.matmul %8, %9, %cst_7 {dimension_numbers = #tpu.dot_dimension_numbers<[1], [0], [0], [1], [0, 0, 1, 1], [], []>} : vector<256x128xbf16>, vector<128x128xbf16>, vector<256x128xf32> -> vector<256x128xf32>
    %c0_8 = arith.constant 0 : index
    %c0_9 = arith.constant 0 : index
    %11 = vector.load %arg5[%c0_8, %c0_9] : memref<1x128xf32, #tpu.memory_space<vmem>>, vector<1x128xf32>
    %12 = vector.broadcast %11 : vector<1x128xf32> to vector<256x128xf32>
    %13 = arith.addf %10, %12 : vector<256x128xf32>
    %14 = math.tanh %13 : vector<256x128xf32>
    %15 = arith.truncf %14 : vector<256x128xf32> to vector<256x128xbf16>
    %c0_10 = arith.constant 0 : index
    %c0_11 = arith.constant 0 : index
    %16 = vector.load %arg6[%c0_10, %c0_11] : memref<128x128xbf16, #tpu.memory_space<vmem>>, vector<128x128xbf16>
    %cst_12 = arith.constant dense<0.000000e+00> : vector<256x128xf32>
    %17 = tpu.matmul %15, %16, %cst_12 {dimension_numbers = #tpu.dot_dimension_numbers<[1], [0], [0], [1], [0, 0, 1, 1], [], []>} : vector<256x128xbf16>, vector<128x128xbf16>, vector<256x128xf32> -> vector<256x128xf32>
    %c0_13 = arith.constant 0 : index
    %c0_14 = arith.constant 0 : index
    %18 = vector.load %arg7[%c0_13, %c0_14] : memref<1x128xf32, #tpu.memory_space<vmem>>, vector<1x128xf32>
    %19 = vector.broadcast %18 : vector<1x128xf32> to vector<256x128xf32>
    %20 = arith.addf %17, %19 : vector<256x128xf32>
    %21 = arith.truncf %20 : vector<256x128xf32> to vector<256x128xbf16>
    %c0_15 = arith.constant 0 : index
    %c0_16 = arith.constant 0 : index
    %22 = vector.load %arg8[%c0_15, %c0_16] : memref<256x128xbf16, #tpu.memory_space<vmem>>, vector<256x128xbf16>
    tpu.vector_store %arg8[%c0_15, %c0_16], %21 {strides = array<i32>} : memref<256x128xbf16, #tpu.memory_space<vmem>>, vector<256x128xbf16>,
    return
  }
  func.func @transform_0(%arg0: i32) -> (i32, i32) {
    %c0_i32 = arith.constant 0 : i32
    %c0_i32_0 = arith.constant 0 : i32
    return %arg0, %c0_i32 : i32, i32
  }
  func.func @transform_1(%arg0: i32) -> (i32, i32) {
    %c0_i32 = arith.constant 0 : i32
    %c0_i32_0 = arith.constant 0 : i32
    %c0_i32_1 = arith.constant 0 : i32
    return %c0_i32, %c0_i32_0 : i32, i32
  }
  func.func @transform_2(%arg0: i32) -> (i32, i32) {
    %c0_i32 = arith.constant 0 : i32
    %c0_i32_0 = arith.constant 0 : i32
    %c0_i32_1 = arith.constant 0 : i32
    return %c0_i32, %c0_i32_0 : i32, i32
  }
  func.func @transform_3(%arg0: i32) -> (i32, i32) {
    %c0_i32 = arith.constant 0 : i32
    %c0_i32_0 = arith.constant 0 : i32
    %c0_i32_1 = arith.constant 0 : i32
    return %c0_i32, %c0_i32_0 : i32, i32
  }
  func.func @transform_4(%arg0: i32) -> (i32, i32) {
    %c0_i32 = arith.constant 0 : i32
    %c0_i32_0 = arith.constant 0 : i32
    %c0_i32_1 = arith.constant 0 : i32
    return %c0_i32, %c0_i32_0 : i32, i32
  }
  func.func @transform_5(%arg0: i32) -> (i32, i32) {
    %c0_i32 = arith.constant 0 : i32
    %c0_i32_0 = arith.constant 0 : i32
    %c0_i32_1 = arith.constant 0 : i32
    return %c0_i32, %c0_i32_0 : i32, i32
  }
  func.func @transform_6(%arg0: i32) -> (i32, i32) {
    %c0_i32 = arith.constant 0 : i32
    %c0_i32_0 = arith.constant 0 : i32
    %c0_i32_1 = arith.constant 0 : i32
    return %c0_i32, %c0_i32_0 : i32, i32
  }
  func.func @transform_7(%arg0: i32) -> (i32, i32) {
    %c0_i32 = arith.constant 0 : i32
    %c0_i32_0 = arith.constant 0 : i32
    return %arg0, %c0_i32 : i32, i32
  }
}

</mosaic_0001>

<bundles_post_ra>
// kernel: tpu_custom_call.1
= control target key start
LH: loop header
LB: loop body
LE: loop exit
PB: predicated region body
PF: predicated region fallthrough
CT: control target
= control target key end

     0   :  { %vm130_vm0 = vcmask 1043456   ;;  %vm81_vm1 = vcmask 64512   ;;  %s1403_s0 = inlined_call_operand.vmem [shape: f32[256,8], index: 0, kind: input, shape index: {}]   ;;  %s1404_s1 = inlined_call_operand.vmem [shape: bf16[8,128], index: 1, kind: input, shape index: {}]   ;;  %s1405_s2 = inlined_call_operand.vmem [shape: f32[1,128], index: 2, kind: input, shape index: {}]   ;;  %s1406_s3 = inlined_call_operand.vmem [shape: bf16[128,128], index: 3, kind: input, shape index: {}]   ;;  %s1407_s4 = inlined_call_operand.vmem [shape: f32[1,128], index: 4, kind: input, shape index: {}]   ;;  %s1408_s5 = inlined_call_operand.vmem [shape: bf16[128,128], index: 5, kind: input, shape index: {}]   ;;  %s1409_s6 = inlined_call_operand.vmem [shape: f32[1,128], index: 6, kind: input, shape index: {}]   ;;  %s1410_s7 = inlined_call_operand.hbm [shape: bf16[256,128], index: 7, kind: output, shape index: {}]  }
   0x1   :  { %v76_v0 = vld [vmem:[%s1404_s1] sm:$0xf]  ;;  %v29_v2 = vld [vmem:[%s1403_s0 + $0x8] sm:$0xff] }
   0x2   :  { %v28_v1 = vld [vmem:[%s1403_s0] sm:$0xff]  ;;  %v132_v3 = vsel %vm130_vm0, %v76_v0, 0 }
   0x3   :  { %v60_v4 = vpack.c.bf16 %v29_v2, %v28_v1  ;;  %141 = vmatpush.bf16.msra.mxu0 %v132_v3  ;;  %906 = vmatpush.bf16.msra.mxu3 %v132_v3 }
   0x4   :  { %12 = vsyncpa [#allocation3], 0  ;;  %v30_v5 = vld [vmem:[%s1403_s0 + $0x10] sm:$0xff]  ;;  %v31_v6 = vld [vmem:[%s1403_s0 + $0x18] sm:$0xff]  ;;  %s703_s28 = sshll.u32 %s1410_s7, 4  ;;  %s1084_s29 = smov 64   ;;  %s704_s28 = int_to_ptr.hbm [resolvable:$true] %s703_s28 }
   0x5   :  { %v61_v7 = vpack.c.bf16 %v31_v6, %v30_v5  ;;  %v32_v8 = vld [vmem:[%s1403_s0 + $0x20] sm:$0xff]  ;;  %v33_v9 = vld [vmem:[%s1403_s0 + $0x28] sm:$0xff]  ;;  %v34_v11 = vld [vmem:[%s1403_s0 + $0x30] sm:$0xff]  ;;  %s1085_s30 = smov 4  }
   0x6   :  { %715 = vmatmul.msk.bf16.vlgmr.msra.gmra.mxu0 %vm81_vm1, %v60_v4  ;;  %v62_v10 = vpack.c.bf16 %v33_v9, %v32_v8  ;;  %v35_v12 = vld [vmem:[%s1403_s0 + $0x38] sm:$0xff]  ;;  %v36_v14 = vld [vmem:[%s1403_s0 + $0x40] sm:$0xff]  ;;  %v37_v15 = vld [vmem:[%s1403_s0 + $0x48] sm:$0xff] }
   0x7   :  { %v63_v13 = vpack.c.bf16 %v35_v12, %v34_v11  ;;  %v64_v16 = vpack.c.bf16 %v37_v15, %v36_v14  ;;  %v38_v17 = vld [vmem:[%s1403_s0 + $0x50] sm:$0xff]  ;;  %v39_v18 = vld [vmem:[%s1403_s0 + $0x58] sm:$0xff]  ;;  %v800_v22 = vld [vmem:[%s1406_s3 + $0x28] sm:$0xff] }
   0x8   :  { %v65_v19 = vpack.c.bf16 %v39_v18, %v38_v17  ;;  %v802_v20 = vld [vmem:[%s1406_s3 + $0x38] sm:$0xff]  ;;  %v801_v21 = vld [vmem:[%s1406_s3 + $0x30] sm:$0xff]  ;;  %v40_v23 = vld [vmem:[%s1403_s0 + $0x60] sm:$0xff] }
   0x9   :  { %339 = vmatpush.bf16.msra.mxu1 %v802_v20  ;;  %907 = vmatpush.bf16.msrb.mxu3 %v802_v20  ;;  %v41_v24 = vld [vmem:[%s1403_s0 + $0x68] sm:$0xff]  ;;  %v799_v26 = vld [vmem:[%s1406_s3 + $0x20] sm:$0xff]  ;;  %v798_v27 = vld [vmem:[%s1406_s3 + $0x18] sm:$0xff] }
   0xa   :  { %v66_v25 = vpack.c.bf16 %v41_v24, %v40_v23  ;;  %v797_v28 = vld [vmem:[%s1406_s3 + $0x10] sm:$0xff]  ;;  %v796_v29 = vld [vmem:[%s1406_s3 + $0x8] sm:$0xff]  ;;  %v43_v31 = vld [vmem:[%s1403_s0 + $0x78] sm:$0xff] }
   0xb   :  { %v42_v30 = vld [vmem:[%s1403_s0 + $0x70] sm:$0xff]  ;;  %v795_v33 = vld [vmem:[%s1406_s3] sm:$0xff]  ;;  %v45_v35 = vld [vmem:[%s1403_s0 + $0x88] sm:$0xff] }
   0xc   :  { %v67_v32 = vpack.c.bf16 %v43_v31, %v42_v30  ;;  %v44_v34 = vld [vmem:[%s1403_s0 + $0x80] sm:$0xff]  ;;  %v46_v42 = vld [vmem:[%s1403_s0 + $0x90] sm:$0xff]  ;;  %v47_v43 = vld [vmem:[%s1403_s0 + $0x98] sm:$0xff] }
   0xd   :  { %340 = vmatpush.bf16.msra.mxu1 %v801_v21  ;;  %908 = vmatpush.bf16.msrb.mxu3 %v801_v21  ;;  %v68_v36 = vpack.c.bf16 %v45_v35, %v44_v34  ;;  %v1218_v38 = vld [vmem:[%s1405_s2] ss:$0 sm:$0xff]  ;;  %v69_v44 = vpack.c.bf16 %v47_v43, %v46_v42  ;;  %v49_v53 = vld [vmem:[%s1403_s0 + $0xa8] sm:$0xff]  ;;  %v54_v59 = vld [vmem:[%s1403_s0 + $0xd0] sm:$0xff] }
   0xe   :  { %v48_v52 = vld [vmem:[%s1403_s0 + $0xa0] sm:$0xff]  ;;  %v55_v60 = vld [vmem:[%s1403_s0 + $0xd8] sm:$0xff]  ;;  %v50_v1 = vld [vmem:[%s1403_s0 + $0xb0] sm:$0xff] }
   0xf   :  { %v70_v54 = vpack.c.bf16 %v49_v53, %v48_v52  ;;  %v73_v61 = vpack.c.bf16 %v55_v60, %v54_v59  ;;  %v51_v2 = vld [vmem:[%s1403_s0 + $0xb8] sm:$0xff]  ;;  %v56_v8 = vld [vmem:[%s1403_s0 + $0xe0] sm:$0xff]  ;;  %v57_v9 = vld [vmem:[%s1403_s0 + $0xe8] sm:$0xff] }
  0x10   :  { %v71_v3 = vpack.c.bf16 %v51_v2, %v50_v1  ;;  %v52_v14 = vld [vmem:[%s1403_s0 + $0xc0] sm:$0xff]  ;;  %v53_v15 = vld [vmem:[%s1403_s0 + $0xc8] sm:$0xff]  ;;  %v58_v21 = vld [vmem:[%s1403_s0 + $0xf0] sm:$0xff] }
  0x11   :  { %341 = vmatpush.bf16.msra.mxu1 %v800_v22  ;;  %909 = vmatpush.bf16.msrb.mxu3 %v800_v22  ;;  %v59_v22 = vld [vmem:[%s1403_s0 + $0xf8] sm:$0xff]  ;;  %v809_v42 = vld [vmem:[%s1408_s5 + $0x30] sm:$0xff] }
  0x12   :  { %728 = vmatmul.msk.bf16.vlgmr.msra.gmra.mxu3 %vm81_vm1, %v73_v61  ;;  %v75_v23 = vpack.c.bf16 %v59_v22, %v58_v21  ;;  %v805_v53 = vld [vmem:[%s1408_s5 + $0x10] sm:$0xff] }
  0x15   :  { %342 = vmatpush.bf16.msra.mxu1 %v799_v26  ;;  %910 = vmatpush.bf16.msrb.mxu3 %v799_v26 }
  0x16   :  { %716 = vmatmul.msk.bf16.gmra.mxu0 %vm81_vm1, %v61_v7 }
  0x19   :  { %343 = vmatpush.bf16.msra.mxu1 %v798_v27  ;;  %911 = vmatpush.bf16.msrb.mxu3 %v798_v27 }
  0x1d   :  { %344 = vmatpush.bf16.msra.mxu1 %v797_v28  ;;  %912 = vmatpush.bf16.msrb.mxu3 %v797_v28 }
  0x21   :  { %345 = vmatpush.bf16.msra.mxu1 %v796_v29  ;;  %913 = vmatpush.bf16.msrb.mxu3 %v796_v29 }
  0x25   :  { %346 = vmatpush.bf16.msra.mxu1 %v795_v33  ;;  %914 = vmatpush.bf16.msrb.mxu3 %v795_v33 }
  0x26   :  { %717 = vmatmul.msk.bf16.gmra.mxu0 %vm81_vm1, %v62_v10  ;;  %v74_v10 = vpack.c.bf16 %v57_v9, %v56_v8 }
  0x28   :  { %729 = vmatmul.msk.bf16.gmra.mxu3 %vm81_vm1, %v74_v10 }
  0x36   :  { %718 = vmatmul.msk.bf16.gmra.mxu0 %vm81_vm1, %v63_v13 }
  0x38   :  { %730 = vmatmul.msk.bf16.gmra.mxu3 %vm81_vm1, %v75_v23 }
  0x46   :  { %719 = vmatmul.msk.bf16.gmra.mxu0 %vm81_vm1, %v64_v16  ;;  %v72_v16 = vpack.c.bf16 %v53_v15, %v52_v14 }
  0x56   :  { %720 = vmatmul.msk.bf16.gmra.mxu0 %vm81_vm1, %v65_v19 }
  0x66   :  { %721 = vmatmul.msk.bf16.gmra.mxu0 %vm81_vm1, %v66_v25 }
  0x76   :  { %722 = vmatmul.msk.bf16.gmra.mxu0 %vm81_vm1, %v67_v32 }
  0x83   :  { %v143_v37 = vpop.f32.mrf.mxu0 }
  0x84   :  { %v144_v39 = vadd.f32 %v1218_v38, %v143_v37 }
  0x86   :  { %723 = vmatmul.msk.bf16.gmra.mxu0 %vm81_vm1, %v68_v36  ;;  %929 = vtanh.f32 %v144_v39  ;;  %v810_v39 = vld [vmem:[%s1408_s5 + $0x38] sm:$0xff] }
  0x87   :  { %544 = vmatpush.bf16.msra.mxu2 %v810_v39  ;;  %915 = vmatpush.bf16.msra.mxu3 %v810_v39 }
  0x8b   :  { %v145_v40 = vpop.f32.mrf.mxu0  ;;  %545 = vmatpush.bf16.msra.mxu2 %v809_v42  ;;  %916 = vmatpush.bf16.msra.mxu3 %v809_v42 }
  0x8c   :  { %v146_v41 = vadd.f32 %v1218_v38, %v145_v40  ;;  %v930_v45 = vpop.eup %929 }
  0x8e   :  { %931 = vtanh.f32 %v146_v41 }
  0x93   :  { %v148_v46 = vpop.f32.mrf.mxu0 }
  0x94   :  { %v932_v47 = vpop.eup %931  ;;  %v149_v49 = vadd.f32 %v1218_v38, %v148_v46 }
  0x95   :  { %v255_v48 = vpack.c.bf16 %v932_v47, %v930_v45  ;;  %v807_v47 = vld [vmem:[%s1408_s5 + $0x20] sm:$0xff] }
  0x96   :  { %724 = vmatmul.msk.bf16.gmra.mxu0 %vm81_vm1, %v69_v44  ;;  %933 = vtanh.f32 %v149_v49  ;;  %v808_v44 = vld [vmem:[%s1408_s5 + $0x28] sm:$0xff] }
  0x97   :  { %347 = vmatmul.bf16.vlgmr.msra.gmra.mxu1 %v255_v48  ;;  %546 = vmatpush.bf16.msra.mxu2 %v808_v44 }
  0x98   :  { %917 = vmatpush.bf16.msra.mxu3 %v808_v44  ;;  %v208_v44 = vpop.f32.mrf.mxu3 }
  0x9b   :  { %v150_v50 = vpop.f32.mrf.mxu0  ;;  %547 = vmatpush.bf16.msra.mxu2 %v807_v47 }
  0x9c   :  { %v151_v51 = vadd.f32 %v1218_v38, %v150_v50  ;;  %v934_v55 = vpop.eup %933  ;;  %918 = vmatpush.bf16.msra.mxu3 %v807_v47  ;;  %v806_v50 = vld [vmem:[%s1408_s5 + $0x18] sm:$0xff] }
  0x9e   :  { %935 = vtanh.f32 %v151_v51 }
  0x9f   :  { %548 = vmatpush.bf16.msra.mxu2 %v806_v50 }
  0xa0   :  { %919 = vmatpush.bf16.msra.mxu3 %v806_v50 }
  0xa3   :  { %v153_v56 = vpop.f32.mrf.mxu0  ;;  %549 = vmatpush.bf16.msra.mxu2 %v805_v53 }
  0xa4   :  { %v936_v57 = vpop.eup %935  ;;  %v154_v62 = vadd.f32 %v1218_v38, %v153_v56  ;;  %920 = vmatpush.bf16.msra.mxu3 %v805_v53 }
  0xa5   :  { %v256_v58 = vpack.c.bf16 %v936_v57, %v934_v55  ;;  %v804_v55 = vld [vmem:[%s1408_s5 + $0x8] sm:$0xff] }
  0xa6   :  { %725 = vmatmul.msk.bf16.gmra.mxu0 %vm81_vm1, %v70_v54  ;;  %937 = vtanh.f32 %v154_v62 }
  0xa7   :  { %352 = vmatmul.bf16.gmra.mxu1 %v256_v58  ;;  %550 = vmatpush.bf16.msra.mxu2 %v804_v55  ;;  %v803_v58 = vld [vmem:[%s1408_s5] sm:$0xff] }
  0xa8   :  { %921 = vmatpush.bf16.msra.mxu3 %v804_v55 }
  0xab   :  { %v155_v63 = vpop.f32.mrf.mxu0  ;;  %551 = vmatpush.bf16.msra.mxu2 %v803_v58 }
  0xac   :  { %v156_v0 = vadd.f32 %v1218_v38, %v155_v63  ;;  %v938_v4 = vpop.eup %937  ;;  %922 = vmatpush.bf16.msra.mxu3 %v803_v58 }
  0xae   :  { %939 = vtanh.f32 %v156_v0 }
  0xb3   :  { %v158_v5 = vpop.f32.mrf.mxu0 }
  0xb4   :  { %v940_v6 = vpop.eup %939  ;;  %v159_v11 = vadd.f32 %v1218_v38, %v158_v5 }
  0xb5   :  { %v257_v7 = vpack.c.bf16 %v940_v6, %v938_v4  ;;  %v1315_v4 = vld [vmem:[%s1407_s4] ss:$0 sm:$0xff] }
  0xb6   :  { %726 = vmatmul.msk.bf16.gmra.mxu0 %vm81_vm1, %v71_v3  ;;  %941 = vtanh.f32 %v159_v11 }
  0xb7   :  { %357 = vmatmul.bf16.gmra.mxu1 %v257_v7 }
  0xbb   :  { %v160_v12 = vpop.f32.mrf.mxu0 }
  0xbc   :  { %v161_v13 = vadd.f32 %v1218_v38, %v160_v12  ;;  %v942_v17 = vpop.eup %941 }
  0xbe   :  { %943 = vtanh.f32 %v161_v13 }
  0xc3   :  { %v163_v18 = vpop.f32.mrf.mxu0 }
  0xc4   :  { %v944_v19 = vpop.eup %943  ;;  %v164_v24 = vadd.f32 %v1218_v38, %v163_v18 }
  0xc5   :  { %v258_v20 = vpack.c.bf16 %v944_v19, %v942_v17 }
  0xc6   :  { %727 = vmatmul.msk.bf16.gmra.mxu0 %vm81_vm1, %v72_v16  ;;  %945 = vtanh.f32 %v164_v24 }
  0xc7   :  { %362 = vmatmul.bf16.gmra.mxu1 %v258_v20 }
  0xcb   :  { %v165_v25 = vpop.f32.mrf.mxu0 }
  0xcc   :  { %v166_v26 = vadd.f32 %v1218_v38, %v165_v25  ;;  %v946_v27 = vpop.eup %945 }
  0xce   :  { %947 = vtanh.f32 %v166_v26 }
  0xd3   :  { %v168_v28 = vpop.f32.mrf.mxu0 }
  0xd4   :  { %v948_v29 = vpop.eup %947  ;;  %v169_v31 = vadd.f32 %v1218_v38, %v168_v28 }
  0xd5   :  { %v259_v30 = vpack.c.bf16 %v948_v29, %v946_v27 }
  0xd6   :  { %949 = vtanh.f32 %v169_v31 }
  0xd7   :  { %367 = vmatmul.bf16.gmra.mxu1 %v259_v30 }
  0xdb   :  { %v170_v32 = vpop.f32.mrf.mxu0 }
  0xdc   :  { %v171_v33 = vadd.f32 %v1218_v38, %v170_v32  ;;  %v950_v34 = vpop.eup %949 }
  0xde   :  { %951 = vtanh.f32 %v171_v33 }
  0xe3   :  { %v173_v35 = vpop.f32.mrf.mxu0 }
  0xe4   :  { %v952_v36 = vpop.eup %951  ;;  %v174_v40 = vadd.f32 %v1218_v38, %v173_v35 }
  0xe5   :  { %v260_v37 = vpack.c.bf16 %v952_v36, %v950_v34 }
  0xe6   :  { %953 = vtanh.f32 %v174_v40 }
  0xe7   :  { %372 = vmatmul.bf16.gmra.mxu1 %v260_v37 }
  0xeb   :  { %v175_v41 = vpop.f32.mrf.mxu0 }
  0xec   :  { %v176_v43 = vadd.f32 %v1218_v38, %v175_v41  ;;  %v954_v45 = vpop.eup %953 }
  0xee   :  { %955 = vtanh.f32 %v176_v43 }
  0xf3   :  { %v178_v46 = vpop.f32.mrf.mxu0 }
  0xf4   :  { %v956_v48 = vpop.eup %955  ;;  %v179_v51 = vadd.f32 %v1218_v38, %v178_v46 }
  0xf5   :  { %v261_v49 = vpack.c.bf16 %v956_v48, %v954_v45 }
  0xf6   :  { %957 = vtanh.f32 %v179_v51 }
  0xf7   :  { %377 = vmatmul.bf16.gmra.mxu1 %v261_v49 }
  0xfb   :  { %v180_v52 = vpop.f32.mrf.mxu0 }
  0xfc   :  { %v181_v54 = vadd.f32 %v1218_v38, %v180_v52  ;;  %v958_v56 = vpop.eup %957 }
  0xfe   :  { %959 = vtanh.f32 %v181_v54 }
 0x103   :  { %v183_v57 = vpop.f32.mrf.mxu0 }
 0x104   :  { %v960_v59 = vpop.eup %959  ;;  %v184_v61 = vadd.f32 %v1218_v38, %v183_v57 }
 0x105   :  { %v262_v60 = vpack.c.bf16 %v960_v59, %v958_v56  ;;  %v210_v56 = vpop.f32.mrf.mxu3 }
 0x106   :  { %961 = vtanh.f32 %v184_v61 }
 0x107   :  { %382 = vmatmul.bf16.gmra.mxu1 %v262_v60 }
 0x10b   :  { %v185_v62 = vpop.f32.mrf.mxu0 }
 0x10c   :  { %v186_v63 = vadd.f32 %v1218_v38, %v185_v62  ;;  %v962_v0 = vpop.eup %961 }
 0x10e   :  { %963 = vtanh.f32 %v186_v63 }
 0x113   :  { %v188_v1 = vpop.f32.mrf.mxu0 }
 0x114   :  { %v964_v2 = vpop.eup %963  ;;  %v348_v3 = vpop.f32.mrf.mxu1  ;;  %v189_v6 = vadd.f32 %v1218_v38, %v188_v1 }
 0x115   :  { %v263_v5 = vpack.c.bf16 %v964_v2, %v962_v0  ;;  %v349_v7 = vadd.f32 %v1315_v4, %v348_v3  ;;  %v209_v0 = vadd.f32 %v1218_v38, %v208_v44  ;;  %v213_v1 = vpop.f32.mrf.mxu3  ;;  %v211_v2 = vadd.f32 %v1218_v38, %v210_v56 }
 0x116   :  { %965 = vtanh.f32 %v189_v6 }
 0x117   :  { %387 = vmatmul.bf16.gmra.mxu1 %v263_v5  ;;  %967 = vtanh.f32 %v349_v7 }
 0x11b   :  { %v190_v8 = vpop.f32.mrf.mxu0 }
 0x11c   :  { %v191_v9 = vadd.f32 %v1218_v38, %v190_v8  ;;  %v350_v10 = vpop.f32.mrf.mxu1  ;;  %v966_v12 = vpop.eup %965 }
 0x11d   :  { %v351_v11 = vadd.f32 %v1315_v4, %v350_v10  ;;  %v968_v13 = vpop.eup %967  ;;  %v215_v8 = vpop.f32.mrf.mxu3 }
 0x11e   :  { %969 = vtanh.f32 %v191_v9 }
 0x11f   :  { %971 = vtanh.f32 %v351_v11 }
 0x123   :  { %v193_v14 = vpop.f32.mrf.mxu0 }
 0x124   :  { %v970_v15 = vpop.eup %969  ;;  %v353_v16 = vpop.f32.mrf.mxu1  ;;  %v194_v20 = vadd.f32 %v1218_v38, %v193_v14 }
 0x125   :  { %v972_v17 = vpop.eup %971  ;;  %v264_v18 = vpack.c.bf16 %v970_v15, %v966_v12  ;;  %v354_v21 = vadd.f32 %v1315_v4, %v353_v16  ;;  %v214_v15 = vadd.f32 %v1218_v38, %v213_v1  ;;  %v216_v16 = vadd.f32 %v1218_v38, %v215_v8 }
 0x126   :  { %v460_v19 = vpack.c.bf16 %v972_v17, %v968_v13  ;;  %973 = vtanh.f32 %v194_v20 }
 0x127   :  { %392 = vmatmul.bf16.gmra.mxu1 %v264_v18  ;;  %975 = vtanh.f32 %v354_v21  ;;  %v218_v18 = vpop.f32.mrf.mxu3 }
 0x128   :  { %552 = vmatmul.bf16.vlgmr.msra.gmra.mxu2 %v460_v19 }
 0x12b   :  { %v195_v22 = vpop.f32.mrf.mxu0 }
 0x12c   :  { %v196_v23 = vadd.f32 %v1218_v38, %v195_v22  ;;  %v355_v24 = vpop.f32.mrf.mxu1  ;;  %v974_v26 = vpop.eup %973 }
 0x12d   :  { %v356_v25 = vadd.f32 %v1315_v4, %v355_v24  ;;  %v976_v27 = vpop.eup %975 }
 0x12e   :  { %977 = vtanh.f32 %v196_v23 }
 0x12f   :  { %979 = vtanh.f32 %v356_v25 }
 0x133   :  { %v198_v28 = vpop.f32.mrf.mxu0 }
 0x134   :  { %v978_v29 = vpop.eup %977  ;;  %v358_v30 = vpop.f32.mrf.mxu1  ;;  %v199_v34 = vadd.f32 %v1218_v38, %v198_v28 }
 0x135   :  { %v980_v31 = vpop.eup %979  ;;  %v265_v32 = vpack.c.bf16 %v978_v29, %v974_v26  ;;  %v359_v35 = vadd.f32 %v1315_v4, %v358_v30  ;;  %v220_v26 = vpop.f32.mrf.mxu3  ;;  %v219_v29 = vadd.f32 %v1218_v38, %v218_v18 }
 0x136   :  { %v461_v33 = vpack.c.bf16 %v980_v31, %v976_v27  ;;  %981 = vtanh.f32 %v199_v34  ;;  %v221_v30 = vadd.f32 %v1218_v38, %v220_v26 }
 0x137   :  { %397 = vmatmul.bf16.gmra.mxu1 %v265_v32  ;;  %983 = vtanh.f32 %v359_v35 }
 0x138   :  { %557 = vmatmul.bf16.gmra.mxu2 %v461_v33 }
 0x13b   :  { %v200_v36 = vpop.f32.mrf.mxu0 }
 0x13c   :  { %v201_v37 = vadd.f32 %v1218_v38, %v200_v36  ;;  %v360_v39 = vpop.f32.mrf.mxu1  ;;  %v982_v41 = vpop.eup %981 }
 0x13d   :  { %v361_v40 = vadd.f32 %v1315_v4, %v360_v39  ;;  %v984_v42 = vpop.eup %983 }
 0x13e   :  { %985 = vtanh.f32 %v201_v37 }
 0x13f   :  { %987 = vtanh.f32 %v361_v40 }
 0x143   :  { %v203_v43 = vpop.f32.mrf.mxu0 }
 0x144   :  { %v986_v45 = vpop.eup %985  ;;  %v363_v46 = vpop.f32.mrf.mxu1  ;;  %v204_v50 = vadd.f32 %v1218_v38, %v203_v43 }
 0x145   :  { %v988_v47 = vpop.eup %987  ;;  %v266_v48 = vpack.c.bf16 %v986_v45, %v982_v41  ;;  %v364_v51 = vadd.f32 %v1315_v4, %v363_v46 }
 0x146   :  { %v462_v49 = vpack.c.bf16 %v988_v47, %v984_v42  ;;  %989 = vtanh.f32 %v204_v50 }
 0x147   :  { %402 = vmatmul.bf16.gmra.mxu1 %v266_v48  ;;  %991 = vtanh.f32 %v364_v51 }
 0x148   :  { %562 = vmatmul.bf16.gmra.mxu2 %v462_v49 }
 0x14b   :  { %v205_v52 = vpop.f32.mrf.mxu0 }
 0x14c   :  { %v206_v53 = vadd.f32 %v1218_v38, %v205_v52  ;;  %v365_v54 = vpop.f32.mrf.mxu1  ;;  %v990_v57 = vpop.eup %989 }
 0x14d   :  { %v366_v55 = vadd.f32 %v1315_v4, %v365_v54  ;;  %v992_v58 = vpop.eup %991 }
 0x14e   :  { %993 = vtanh.f32 %v206_v53 }
 0x14f   :  { %995 = vtanh.f32 %v366_v55 }
 0x150   :  { %997 = vtanh.f32 %v209_v0 }
 0x151   :  { %999 = vtanh.f32 %v211_v2 }
 0x154   :  { %v994_v59 = vpop.eup %993  ;;  %v368_v60 = vpop.f32.mrf.mxu1 }
 0x155   :  { %v996_v61 = vpop.eup %995  ;;  %v267_v62 = vpack.c.bf16 %v994_v59, %v990_v57  ;;  %v369_v3 = vadd.f32 %v1315_v4, %v368_v60  ;;  %v1354_v59 = vld [vmem:[%s1409_s6] ss:$0 sm:$0xff]  ;;  %s1083_s6 = smov [#allocation2]  }
 0x156   :  { %v463_v63 = vpack.c.bf16 %v996_v61, %v992_v58  ;;  %v998_v7 = vpop.eup %997  ;;  %s701_s25 = sshll.u32 %s1083_s6, 4  ;;  %s702_s25 = int_to_ptr.vmem [resolvable:$true] %s701_s25 }
 0x157   :  { %407 = vmatmul.bf16.vlgmr.msrb.gmra.mxu3 %v267_v62  ;;  %1001 = vtanh.f32 %v369_v3  ;;  %v1000_v9 = vpop.eup %999 }
 0x158   :  { %567 = vmatmul.bf16.gmra.mxu2 %v463_v63  ;;  %v268_v13 = vpack.c.bf16 %v1000_v9, %v998_v7 }
 0x15c   :  { %v370_v5 = vpop.f32.mrf.mxu1 }
 0x15d   :  { %v371_v6 = vadd.f32 %v1315_v4, %v370_v5  ;;  %v1002_v10 = vpop.eup %1001 }
 0x15f   :  { %1003 = vtanh.f32 %v371_v6 }
 0x160   :  { %1005 = vtanh.f32 %v214_v15 }
 0x161   :  { %1007 = vtanh.f32 %v216_v16 }
 0x164   :  { %v373_v11 = vpop.f32.mrf.mxu1 }
 0x165   :  { %v1004_v12 = vpop.eup %1003  ;;  %v374_v17 = vadd.f32 %v1315_v4, %v373_v11 }
 0x166   :  { %v464_v14 = vpack.c.bf16 %v1004_v12, %v1002_v10  ;;  %v1006_v21 = vpop.eup %1005 }
 0x167   :  { %412 = vmatmul.bf16.gmra.mxu3 %v268_v13  ;;  %1009 = vtanh.f32 %v374_v17  ;;  %v1008_v22 = vpop.eup %1007 }
 0x168   :  { %572 = vmatmul.bf16.gmra.mxu2 %v464_v14  ;;  %v269_v27 = vpack.c.bf16 %v1008_v22, %v1006_v21 }
 0x16c   :  { %v375_v19 = vpop.f32.mrf.mxu1 }
 0x16d   :  { %v376_v20 = vadd.f32 %v1315_v4, %v375_v19  ;;  %v1010_v23 = vpop.eup %1009 }
 0x16f   :  { %1011 = vtanh.f32 %v376_v20 }
 0x170   :  { %1013 = vtanh.f32 %v219_v29 }
 0x171   :  { %1015 = vtanh.f32 %v221_v30 }
 0x174   :  { %v378_v24 = vpop.f32.mrf.mxu1 }
 0x175   :  { %v1012_v25 = vpop.eup %1011  ;;  %v379_v31 = vadd.f32 %v1315_v4, %v378_v24 }
 0x176   :  { %v465_v28 = vpack.c.bf16 %v1012_v25, %v1010_v23  ;;  %v1014_v34 = vpop.eup %1013 }
 0x177   :  { %417 = vmatmul.bf16.gmra.mxu3 %v269_v27  ;;  %1017 = vtanh.f32 %v379_v31  ;;  %v1016_v35 = vpop.eup %1015 }
 0x178   :  { %577 = vmatmul.bf16.gmra.mxu2 %v465_v28  ;;  %v270_v40 = vpack.c.bf16 %v1016_v35, %v1014_v34 }
 0x17c   :  { %v380_v32 = vpop.f32.mrf.mxu1 }
 0x17d   :  { %v381_v33 = vadd.f32 %v1315_v4, %v380_v32  ;;  %v1018_v36 = vpop.eup %1017 }
 0x17f   :  { %1019 = vtanh.f32 %v381_v33 }
 0x184   :  { %v383_v37 = vpop.f32.mrf.mxu1 }
 0x185   :  { %v1020_v39 = vpop.eup %1019  ;;  %v384_v38 = vadd.f32 %v1315_v4, %v383_v37 }
 0x186   :  { %v466_v41 = vpack.c.bf16 %v1020_v39, %v1018_v36 }
 0x187   :  { %422 = vmatmul.bf16.gmra.mxu3 %v270_v40  ;;  %1021 = vtanh.f32 %v384_v38 }
 0x188   :  { %582 = vmatmul.bf16.gmra.mxu2 %v466_v41 }
 0x18c   :  { %v385_v42 = vpop.f32.mrf.mxu1 }
 0x18d   :  { %v386_v43 = vadd.f32 %v1315_v4, %v385_v42  ;;  %v1022_v44 = vpop.eup %1021 }
 0x18f   :  { %1023 = vtanh.f32 %v386_v43 }
 0x194   :  { %v388_v45 = vpop.f32.mrf.mxu1 }
 0x195   :  { %v1024_v46 = vpop.eup %1023  ;;  %v389_v48 = vadd.f32 %v1315_v4, %v388_v45 }
 0x196   :  { %v467_v47 = vpack.c.bf16 %v1024_v46, %v1022_v44 }
 0x197   :  { %1025 = vtanh.f32 %v389_v48 }
 0x198   :  { %587 = vmatmul.bf16.gmra.mxu2 %v467_v47 }
 0x19c   :  { %v390_v49 = vpop.f32.mrf.mxu1 }
 0x19d   :  { %v391_v50 = vadd.f32 %v1315_v4, %v390_v49  ;;  %v1026_v51 = vpop.eup %1025 }
 0x19f   :  { %1027 = vtanh.f32 %v391_v50 }
 0x1a4   :  { %v393_v52 = vpop.f32.mrf.mxu1 }
 0x1a5   :  { %v1028_v53 = vpop.eup %1027  ;;  %v394_v55 = vadd.f32 %v1315_v4, %v393_v52 }
 0x1a6   :  { %v468_v54 = vpack.c.bf16 %v1028_v53, %v1026_v51 }
 0x1a7   :  { %1029 = vtanh.f32 %v394_v55 }
 0x1a8   :  { %592 = vmatmul.bf16.gmra.mxu2 %v468_v54 }
 0x1ab   :  { %v553_v56 = vpop.f32.mrf.mxu2 }
 0x1ac   :  { %v395_v57 = vpop.f32.mrf.mxu1  ;;  %v554_v62 = vadd.f32 %v1354_v59, %v553_v56 }
 0x1ad   :  { %v396_v58 = vadd.f32 %v1315_v4, %v395_v57  ;;  %v1030_v61 = vpop.eup %1029 }
 0x1af   :  { %1031 = vtanh.f32 %v396_v58 }
 0x1b3   :  { %v555_v60 = vpop.f32.mrf.mxu2 }
 0x1b4   :  { %v556_v63 = vadd.f32 %v1354_v59, %v555_v60  ;;  %v398_v0 = vpop.f32.mrf.mxu1 }
 0x1b5   :  { %v1032_v1 = vpop.eup %1031  ;;  %v399_v5 = vadd.f32 %v1315_v4, %v398_v0 }
 0x1b6   :  { %v814_v2 = vpack.c.bf16 %v556_v63, %v554_v62  ;;  %v469_v3 = vpack.c.bf16 %v1032_v1, %v1030_v61 }
 0x1b7   :  { %1033 = vtanh.f32 %v399_v5 }
 0x1b8   :  { %815 = vst [vmem:[#allocation2] sm:$0xff] %v814_v2   ;;  %597 = vmatmul.bf16.gmra.mxu2 %v469_v3 }
 0x1bb   :  { %v558_v6 = vpop.f32.mrf.mxu2 }
 0x1bc   :  { %v400_v7 = vpop.f32.mrf.mxu1  ;;  %v559_v11 = vadd.f32 %v1354_v59, %v558_v6 }
 0x1bd   :  { %v401_v8 = vadd.f32 %v1315_v4, %v400_v7  ;;  %v1034_v10 = vpop.eup %1033 }
 0x1bf   :  { %1035 = vtanh.f32 %v401_v8 }
 0x1c3   :  { %v560_v9 = vpop.f32.mrf.mxu2 }
 0x1c4   :  { %v561_v12 = vadd.f32 %v1354_v59, %v560_v9  ;;  %v403_v13 = vpop.f32.mrf.mxu1 }
 0x1c5   :  { %v1036_v14 = vpop.eup %1035  ;;  %v404_v17 = vadd.f32 %v1315_v4, %v403_v13 }
 0x1c6   :  { %v819_v15 = vpack.c.bf16 %v561_v12, %v559_v11  ;;  %v470_v16 = vpack.c.bf16 %v1036_v14, %v1034_v10 }
 0x1c7   :  { %1037 = vtanh.f32 %v404_v17 }
 0x1c8   :  { %891 = vst [vmem:[#allocation2 + $0x8] sm:$0xff] %v819_v15   ;;  %602 = vmatmul.bf16.gmra.mxu2 %v470_v16 }
 0x1cb   :  { %v563_v18 = vpop.f32.mrf.mxu2 }
 0x1cc   :  { %v405_v19 = vpop.f32.mrf.mxu1  ;;  %v564_v23 = vadd.f32 %v1354_v59, %v563_v18 }
 0x1cd   :  { %v406_v20 = vadd.f32 %v1315_v4, %v405_v19  ;;  %v1038_v22 = vpop.eup %1037 }
 0x1cf   :  { %1039 = vtanh.f32 %v406_v20 }
 0x1d3   :  { %v565_v21 = vpop.f32.mrf.mxu2 }
 0x1d4   :  { %v566_v24 = vadd.f32 %v1354_v59, %v565_v21 }
 0x1d5   :  { %v1040_v25 = vpop.eup %1039 }
 0x1d6   :  { %v824_v26 = vpack.c.bf16 %v566_v24, %v564_v23  ;;  %v471_v27 = vpack.c.bf16 %v1040_v25, %v1038_v22 }
 0x1d8   :  { %892 = vst [vmem:[#allocation2 + $0x10] sm:$0xff] %v824_v26   ;;  %607 = vmatmul.bf16.gmra.mxu2 %v471_v27 }
 0x1da   :  { %v408_v28 = vpop.f32.mrf.mxu3 }
 0x1db   :  { %v568_v29 = vpop.f32.mrf.mxu2  ;;  %v409_v30 = vadd.f32 %v1315_v4, %v408_v28 }
 0x1dc   :  { %v569_v34 = vadd.f32 %v1354_v59, %v568_v29 }
 0x1dd   :  { %1041 = vtanh.f32 %v409_v30 }
 0x1e2   :  { %v410_v31 = vpop.f32.mrf.mxu3 }
 0x1e3   :  { %v411_v32 = vadd.f32 %v1315_v4, %v410_v31  ;;  %v570_v33 = vpop.f32.mrf.mxu2  ;;  %v1042_v37 = vpop.eup %1041 }
 0x1e4   :  { %v571_v35 = vadd.f32 %v1354_v59, %v570_v33 }
 0x1e5   :  { %1043 = vtanh.f32 %v411_v32 }
 0x1e6   :  { %v829_v36 = vpack.c.bf16 %v571_v35, %v569_v34 }
 0x1e8   :  { %893 = vst [vmem:[#allocation2 + $0x18] sm:$0xff] %v829_v36  }
 0x1ea   :  { %v413_v39 = vpop.f32.mrf.mxu3 }
 0x1eb   :  { %v1044_v40 = vpop.eup %1043  ;;  %v573_v41 = vpop.f32.mrf.mxu2  ;;  %v414_v42 = vadd.f32 %v1315_v4, %v413_v39 }
 0x1ec   :  { %v472_v38 = vpack.c.bf16 %v1044_v40, %v1042_v37  ;;  %v574_v46 = vadd.f32 %v1354_v59, %v573_v41 }
 0x1ed   :  { %1045 = vtanh.f32 %v414_v42 }
 0x1ee   :  { %612 = vmatmul.bf16.vlgmr.msra.gmra.mxu3 %v472_v38 }
 0x1f2   :  { %v415_v43 = vpop.f32.mrf.mxu3 }
 0x1f3   :  { %v416_v44 = vadd.f32 %v1315_v4, %v415_v43  ;;  %v575_v45 = vpop.f32.mrf.mxu2  ;;  %v1046_v49 = vpop.eup %1045 }
 0x1f4   :  { %v576_v47 = vadd.f32 %v1354_v59, %v575_v45 }
 0x1f5   :  { %1047 = vtanh.f32 %v416_v44 }
 0x1f6   :  { %v834_v48 = vpack.c.bf16 %v576_v47, %v574_v46 }
 0x1f8   :  { %894 = vst [vmem:[#allocation2 + $0x20] sm:$0xff] %v834_v48  }
 0x1fa   :  { %v418_v50 = vpop.f32.mrf.mxu3 }
 0x1fb   :  { %v1048_v51 = vpop.eup %1047  ;;  %v578_v52 = vpop.f32.mrf.mxu2  ;;  %v419_v54 = vadd.f32 %v1315_v4, %v418_v50 }
 0x1fc   :  { %v473_v53 = vpack.c.bf16 %v1048_v51, %v1046_v49  ;;  %v579_v58 = vadd.f32 %v1354_v59, %v578_v52 }
 0x1fd   :  { %1049 = vtanh.f32 %v419_v54 }
 0x1fe   :  { %617 = vmatmul.bf16.gmra.mxu3 %v473_v53 }
 0x202   :  { %v420_v55 = vpop.f32.mrf.mxu3 }
 0x203   :  { %v421_v56 = vadd.f32 %v1315_v4, %v420_v55  ;;  %v580_v57 = vpop.f32.mrf.mxu2  ;;  %v1050_v62 = vpop.eup %1049 }
 0x204   :  { %v581_v60 = vadd.f32 %v1354_v59, %v580_v57 }
 0x205   :  { %1051 = vtanh.f32 %v421_v56 }
 0x206   :  { %v839_v61 = vpack.c.bf16 %v581_v60, %v579_v58 }
 0x208   :  { %895 = vst [vmem:[#allocation2 + $0x28] sm:$0xff] %v839_v61  }
 0x20a   :  { %v423_v63 = vpop.f32.mrf.mxu3 }
 0x20b   :  { %v1052_v0 = vpop.eup %1051  ;;  %v583_v1 = vpop.f32.mrf.mxu2  ;;  %v424_v3 = vadd.f32 %v1315_v4, %v423_v63 }
 0x20c   :  { %v474_v2 = vpack.c.bf16 %v1052_v0, %v1050_v62  ;;  %v584_v8 = vadd.f32 %v1354_v59, %v583_v1 }
 0x20d   :  { %1053 = vtanh.f32 %v424_v3 }
 0x20e   :  { %622 = vmatmul.bf16.gmra.mxu3 %v474_v2 }
 0x212   :  { %v425_v5 = vpop.f32.mrf.mxu3 }
 0x213   :  { %v426_v6 = vadd.f32 %v1315_v4, %v425_v5  ;;  %v585_v7 = vpop.f32.mrf.mxu2  ;;  %v1054_v11 = vpop.eup %1053 }
 0x214   :  { %v586_v9 = vadd.f32 %v1354_v59, %v585_v7 }
 0x215   :  { %1055 = vtanh.f32 %v426_v6 }
 0x216   :  { %v844_v10 = vpack.c.bf16 %v586_v9, %v584_v8 }
 0x218   :  { %896 = vst [vmem:[#allocation2 + $0x30] sm:$0xff] %v844_v10  }
 0x21b   :  { %v1056_v12 = vpop.eup %1055  ;;  %v588_v13 = vpop.f32.mrf.mxu2 }
 0x21c   :  { %v475_v14 = vpack.c.bf16 %v1056_v12, %v1054_v11  ;;  %v589_v16 = vadd.f32 %v1354_v59, %v588_v13 }
 0x21e   :  { %627 = vmatmul.bf16.gmra.mxu3 %v475_v14 }
 0x223   :  { %v590_v15 = vpop.f32.mrf.mxu2 }
 0x224   :  { %v591_v17 = vadd.f32 %v1354_v59, %v590_v15 }
 0x226   :  { %v849_v4 = vpack.c.bf16 %v591_v17, %v589_v16 }
 0x228   :  { %897 = vst [vmem:[#allocation2 + $0x38] sm:$0xff] %v849_v4  }
 0x22b   :  { %v593_v18 = vpop.f32.mrf.mxu2 }
 0x22c   :  { %v594_v20 = vadd.f32 %v1354_v59, %v593_v18 }
 0x233   :  { %v595_v19 = vpop.f32.mrf.mxu2 }
 0x234   :  { %v596_v21 = vadd.f32 %v1354_v59, %v595_v19 }
 0x236   :  { %v854_v22 = vpack.c.bf16 %v596_v21, %v594_v20 }
 0x238   :  { %898 = vst [vmem:[#allocation2 + $0x40] sm:$0xff] %v854_v22  }
 0x23b   :  { %v598_v23 = vpop.f32.mrf.mxu2 }
 0x23c   :  { %v599_v25 = vadd.f32 %v1354_v59, %v598_v23 }
 0x243   :  { %v600_v24 = vpop.f32.mrf.mxu2 }
 0x244   :  { %v601_v26 = vadd.f32 %v1354_v59, %v600_v24 }
 0x246   :  { %v859_v27 = vpack.c.bf16 %v601_v26, %v599_v25 }
 0x248   :  { %899 = vst [vmem:[#allocation2 + $0x48] sm:$0xff] %v859_v27  }
 0x24b   :  { %v603_v28 = vpop.f32.mrf.mxu2 }
 0x24c   :  { %v604_v30 = vadd.f32 %v1354_v59, %v603_v28 }
 0x253   :  { %v605_v29 = vpop.f32.mrf.mxu2 }
 0x254   :  { %v606_v31 = vadd.f32 %v1354_v59, %v605_v29 }
 0x256   :  { %v864_v32 = vpack.c.bf16 %v606_v31, %v604_v30 }
 0x258   :  { %900 = vst [vmem:[#allocation2 + $0x50] sm:$0xff] %v864_v32  }
 0x25b   :  { %v608_v33 = vpop.f32.mrf.mxu2 }
 0x25c   :  { %v609_v35 = vadd.f32 %v1354_v59, %v608_v33 }
 0x263   :  { %v610_v34 = vpop.f32.mrf.mxu2 }
 0x264   :  { %v611_v36 = vadd.f32 %v1354_v59, %v610_v34 }
 0x266   :  { %v869_v37 = vpack.c.bf16 %v611_v36, %v609_v35 }
 0x268   :  { %901 = vst [vmem:[#allocation2 + $0x58] sm:$0xff] %v869_v37  }
 0x271   :  { %v613_v39 = vpop.f32.mrf.mxu3 }
 0x272   :  { %v614_v41 = vadd.f32 %v1354_v59, %v613_v39 }
 0x279   :  { %v615_v40 = vpop.f32.mrf.mxu3 }
 0x27a   :  { %v616_v38 = vadd.f32 %v1354_v59, %v615_v40 }
 0x27c   :  { %v874_v42 = vpack.c.bf16 %v616_v38, %v614_v41 }
 0x27e   :  { %902 = vst [vmem:[#allocation2 + $0x60] sm:$0xff] %v874_v42  }
 0x281   :  { %v618_v43 = vpop.f32.mrf.mxu3 }
 0x282   :  { %v619_v45 = vadd.f32 %v1354_v59, %v618_v43 }
 0x289   :  { %v620_v44 = vpop.f32.mrf.mxu3 }
 0x28a   :  { %v621_v46 = vadd.f32 %v1354_v59, %v620_v44 }
 0x28c   :  { %v879_v47 = vpack.c.bf16 %v621_v46, %v619_v45 }
 0x28e   :  { %903 = vst [vmem:[#allocation2 + $0x68] sm:$0xff] %v879_v47  }
 0x291   :  { %v623_v48 = vpop.f32.mrf.mxu3 }
 0x292   :  { %v624_v50 = vadd.f32 %v1354_v59, %v623_v48 }
 0x299   :  { %v625_v49 = vpop.f32.mrf.mxu3 }
 0x29a   :  { %v626_v51 = vadd.f32 %v1354_v59, %v625_v49 }
 0x29c   :  { %v884_v52 = vpack.c.bf16 %v626_v51, %v624_v50 }
 0x29e   :  { %904 = vst [vmem:[#allocation2 + $0x70] sm:$0xff] %v884_v52  }
 0x2a1   :  { %v628_v53 = vpop.f32.mrf.mxu3 }
 0x2a2   :  { %v629_v55 = vadd.f32 %v1354_v59, %v628_v53 }
 0x2a9   :  { %v630_v54 = vpop.f32.mrf.mxu3 }
 0x2aa   :  { %v631_v56 = vadd.f32 %v1354_v59, %v630_v54 }
 0x2ac   :  { %v889_v57 = vpack.c.bf16 %v631_v56, %v629_v55 }
 0x2ae   :  { %905 = vst [vmem:[#allocation2 + $0x78] sm:$0xff] %v889_v57  }
 0x2af   :  { %709 = dma.vmem_to_hbm [thread:$0]  %s702_s25, 2048, %s704_s28, [#allocation3], %s1084_s29, %s1084_s29, %s1085_s30  }
 0x2b0   :  { %1081 = dma.done.wait [#allocation3], 2048  }
 0x2b1   :  { %1082 = vsyncadd [#allocation3], 4294965248 }
 0x2b2   :  { %714 = vsyncpa [#allocation3], 1 }

// kernel: tpu_custom_call.1
= control target key start
LH: loop header
LB: loop body
LE: loop exit
PB: predicated region body
PF: predicated region fallthrough
CT: control target
= control target key end

     0   :  { %vm130_vm0 = vcmask 1043456   ;;  %vm81_vm1 = vcmask 64512   ;;  %s1403_s0 = inlined_call_operand.vmem [shape: f32[256,8], index: 0, kind: input, shape index: {}]   ;;  %s1404_s1 = inlined_call_operand.vmem [shape: bf16[8,128], index: 1, kind: input, shape index: {}]   ;;  %s1405_s2 = inlined_call_operand.vmem [shape: f32[1,128], index: 2, kind: input, shape index: {}]   ;;  %s1406_s3 = inlined_call_operand.vmem [shape: bf16[128,128], index: 3, kind: input, shape index: {}]   ;;  %s1407_s4 = inlined_call_operand.vmem [shape: f32[1,128], index: 4, kind: input, shape index: {}]   ;;  %s1408_s5 = inlined_call_operand.vmem [shape: bf16[128,128], index: 5, kind: input, shape index: {}]   ;;  %s1409_s6 = inlined_call_operand.vmem [shape: f32[1,128], index: 6, kind: input, shape index: {}]   ;;  %s1410_s7 = inlined_call_operand.hbm [shape: bf16[256,128], index: 7, kind: output, shape index: {}]  }
   0x1   :  { %v76_v0 = vld [vmem:[%s1404_s1] sm:$0xf]  ;;  %v29_v2 = vld [vmem:[%s1403_s0 + $0x8] sm:$0xff] }
   0x2   :  { %v28_v1 = vld [vmem:[%s1403_s0] sm:$0xff]  ;;  %v132_v3 = vsel %vm130_vm0, %v76_v0, 0 }
   0x3   :  { %v60_v4 = vpack.c.bf16 %v29_v2, %v28_v1  ;;  %141 = vmatpush.bf16.msra.mxu0 %v132_v3  ;;  %906 = vmatpush.bf16.msra.mxu3 %v132_v3 }
   0x4   :  { %12 = vsyncpa [#allocation3], 0  ;;  %v30_v5 = vld [vmem:[%s1403_s0 + $0x10] sm:$0xff]  ;;  %v31_v6 = vld [vmem:[%s1403_s0 + $0x18] sm:$0xff]  ;;  %s703_s28 = sshll.u32 %s1410_s7, 4  ;;  %s1084_s29 = smov 64   ;;  %s704_s28 = int_to_ptr.hbm [resolvable:$true] %s703_s28 }
   0x5   :  { %v61_v7 = vpack.c.bf16 %v31_v6, %v30_v5  ;;  %v32_v8 = vld [vmem:[%s1403_s0 + $0x20] sm:$0xff]  ;;  %v33_v9 = vld [vmem:[%s1403_s0 + $0x28] sm:$0xff]  ;;  %v34_v11 = vld [vmem:[%s1403_s0 + $0x30] sm:$0xff]  ;;  %s1085_s30 = smov 4  }
   0x6   :  { %715 = vmatmul.msk.bf16.vlgmr.msra.gmra.mxu0 %vm81_vm1, %v60_v4  ;;  %v62_v10 = vpack.c.bf16 %v33_v9, %v32_v8  ;;  %v35_v12 = vld [vmem:[%s1403_s0 + $0x38] sm:$0xff]  ;;  %v36_v14 = vld [vmem:[%s1403_s0 + $0x40] sm:$0xff]  ;;  %v37_v15 = vld [vmem:[%s1403_s0 + $0x48] sm:$0xff] }
   0x7   :  { %v63_v13 = vpack.c.bf16 %v35_v12, %v34_v11  ;;  %v64_v16 = vpack.c.bf16 %v37_v15, %v36_v14  ;;  %v38_v17 = vld [vmem:[%s1403_s0 + $0x50] sm:$0xff]  ;;  %v39_v18 = vld [vmem:[%s1403_s0 + $0x58] sm:$0xff]  ;;  %v800_v22 = vld [vmem:[%s1406_s3 + $0x28] sm:$0xff] }
   0x8   :  { %v65_v19 = vpack.c.bf16 %v39_v18, %v38_v17  ;;  %v802_v20 = vld [vmem:[%s1406_s3 + $0x38] sm:$0xff]  ;;  %v801_v21 = vld [vmem:[%s1406_s3 + $0x30] sm:$0xff]  ;;  %v40_v23 = vld [vmem:[%s1403_s0 + $0x60] sm:$0xff] }
   0x9   :  { %339 = vmatpush.bf16.msra.mxu1 %v802_v20  ;;  %907 = vmatpush.bf16.msrb.mxu3 %v802_v20  ;;  %v41_v24 = vld [vmem:[%s1403_s0 + $0x68] sm:$0xff]  ;;  %v799_v26 = vld [vmem:[%s1406_s3 + $0x20] sm:$0xff]  ;;  %v798_v27 = vld [vmem:[%s1406_s3 + $0x18] sm:$0xff] }
   0xa   :  { %v66_v25 = vpack.c.bf16 %v41_v24, %v40_v23  ;;  %v797_v28 = vld [vmem:[%s1406_s3 + $0x10] sm:$0xff]  ;;  %v796_v29 = vld [vmem:[%s1406_s3 + $0x8] sm:$0xff]  ;;  %v43_v31 = vld [vmem:[%s1403_s0 + $0x78] sm:$0xff] }
   0xb   :  { %v42_v30 = vld [vmem:[%s1403_s0 + $0x70] sm:$0xff]  ;;  %v795_v33 = vld [vmem:[%s1406_s3] sm:$0xff]  ;;  %v45_v35 = vld [vmem:[%s1403_s0 + $0x88] sm:$0xff] }
   0xc   :  { %v67_v32 = vpack.c.bf16 %v43_v31, %v42_v30  ;;  %v44_v34 = vld [vmem:[%s1403_s0 + $0x80] sm:$0xff]  ;;  %v46_v42 = vld [vmem:[%s1403_s0 + $0x90] sm:$0xff]  ;;  %v47_v43 = vld [vmem:[%s1403_s0 + $0x98] sm:$0xff] }
   0xd   :  { %340 = vmatpush.bf16.msra.mxu1 %v801_v21  ;;  %908 = vmatpush.bf16.msrb.mxu3 %v801_v21  ;;  %v68_v36 = vpack.c.bf16 %v45_v35, %v44_v34  ;;  %v1218_v38 = vld [vmem:[%s1405_s2] ss:$0 sm:$0xff]  ;;  %v69_v44 = vpack.c.bf16 %v47_v43, %v46_v42  ;;  %v49_v53 = vld [vmem:[%s1403_s0 + $0xa8] sm:$0xff]  ;;  %v54_v59 = vld [vmem:[%s1403_s0 + $0xd0] sm:$0xff] }
   0xe   :  { %v48_v52 = vld [vmem:[%s1403_s0 + $0xa0] sm:$0xff]  ;;  %v55_v60 = vld [vmem:[%s1403_s0 + $0xd8] sm:$0xff]  ;;  %v50_v1 = vld [vmem:[%s1403_s0 + $0xb0] sm:$0xff] }
   0xf   :  { %v70_v54 = vpack.c.bf16 %v49_v53, %v48_v52  ;;  %v73_v61 = vpack.c.bf16 %v55_v60, %v54_v59  ;;  %v51_v2 = vld [vmem:[%s1403_s0 + $0xb8] sm:$0xff]  ;;  %v56_v8 = vld [vmem:[%s1403_s0 + $0xe0] sm:$0xff]  ;;  %v57_v9 = vld [vmem:[%s1403_s0 + $0xe8] sm:$0xff] }
  0x10   :  { %v71_v3 = vpack.c.bf16 %v51_v2, %v50_v1  ;;  %v52_v14 = vld [vmem:[%s1403_s0 + $0xc0] sm:$0xff]  ;;  %v53_v15 = vld [vmem:[%s1403_s0 + $0xc8] sm:$0xff]  ;;  %v58_v21 = vld [vmem:[%s1403_s0 + $0xf0] sm:$0xff] }
  0x11   :  { %341 = vmatpush.bf16.msra.mxu1 %v800_v22  ;;  %909 = vmatpush.bf16.msrb.mxu3 %v800_v22  ;;  %v59_v22 = vld [vmem:[%s1403_s0 + $0xf8] sm:$0xff]  ;;  %v809_v42 = vld [vmem:[%s1408_s5 + $0x30] sm:$0xff] }
  0x12   :  { %728 = vmatmul.msk.bf16.vlgmr.msra.gmra.mxu3 %vm81_vm1, %v73_v61  ;;  %v75_v23 = vpack.c.bf16 %v59_v22, %v58_v21  ;;  %v805_v53 = vld [vmem:[%s1408_s5 + $0x10] sm:$0xff] }
  0x15   :  { %342 = vmatpush.bf16.msra.mxu1 %v799_v26  ;;  %910 = vmatpush.bf16.msrb.mxu3 %v799_v26 }
  0x16   :  { %716 = vmatmul.msk.bf16.gmra.mxu0 %vm81_vm1, %v61_v7 }
  0x19   :  { %343 = vmatpush.bf16.msra.mxu1 %v798_v27  ;;  %911 = vmatpush.bf16.msrb.mxu3 %v798_v27 }
  0x1d   :  { %344 = vmatpush.bf16.msra.mxu1 %v797_v28  ;;  %912 = vmatpush.bf16.msrb.mxu3 %v797_v28 }
  0x21   :  { %345 = vmatpush.bf16.msra.mxu1 %v796_v29  ;;  %913 = vmatpush.bf16.msrb.mxu3 %v796_v29 }
  0x25   :  { %346 = vmatpush.bf16.msra.mxu1 %v795_v33  ;;  %914 = vmatpush.bf16.msrb.mxu3 %v795_v33 }
  0x26   :  { %717 = vmatmul.msk.bf16.gmra.mxu0 %vm81_vm1, %v62_v10  ;;  %v74_v10 = vpack.c.bf16 %v57_v9, %v56_v8 }
  0x28   :  { %729 = vmatmul.msk.bf16.gmra.mxu3 %vm81_vm1, %v74_v10 }
  0x36   :  { %718 = vmatmul.msk.bf16.gmra.mxu0 %vm81_vm1, %v63_v13 }
  0x38   :  { %730 = vmatmul.msk.bf16.gmra.mxu3 %vm81_vm1, %v75_v23 }
  0x46   :  { %719 = vmatmul.msk.bf16.gmra.mxu0 %vm81_vm1, %v64_v16  ;;  %v72_v16 = vpack.c.bf16 %v53_v15, %v52_v14 }
  0x56   :  { %720 = vmatmul.msk.bf16.gmra.mxu0 %vm81_vm1, %v65_v19 }
  0x66   :  { %721 = vmatmul.msk.bf16.gmra.mxu0 %vm81_vm1, %v66_v25 }
  0x76   :  { %722 = vmatmul.msk.bf16.gmra.mxu0 %vm81_vm1, %v67_v32 }
  0x83   :  { %v143_v37 = vpop.f32.mrf.mxu0 }
  0x84   :  { %v144_v39 = vadd.f32 %v1218_v38, %v143_v37 }
  0x86   :  { %723 = vmatmul.msk.bf16.gmra.mxu0 %vm81_vm1, %v68_v36  ;;  %929 = vtanh.f32 %v144_v39  ;;  %v810_v39 = vld [vmem:[%s1408_s5 + $0x38] sm:$0xff] }
  0x87   :  { %544 = vmatpush.bf16.msra.mxu2 %v810_v39  ;;  %915 = vmatpush.bf16.msra.mxu3 %v810_v39 }
  0x8b   :  { %v145_v40 = vpop.f32.mrf.mxu0  ;;  %545 = vmatpush.bf16.msra.mxu2 %v809_v42  ;;  %916 = vmatpush.bf16.msra.mxu3 %v809_v42 }
  0x8c   :  { %v146_v41 = vadd.f32 %v1218_v38, %v145_v40  ;;  %v930_v45 = vpop.eup %929 }
  0x8e   :  { %931 = vtanh.f32 %v146_v41 }
  0x93   :  { %v148_v46 = vpop.f32.mrf.mxu0 }
  0x94   :  { %v932_v47 = vpop.eup %931  ;;  %v149_v49 = vadd.f32 %v1218_v38, %v148_v46 }
  0x95   :  { %v255_v48 = vpack.c.bf16 %v932_v47, %v930_v45  ;;  %v807_v47 = vld [vmem:[%s1408_s5 + $0x20] sm:$0xff] }
  0x96   :  { %724 = vmatmul.msk.bf16.gmra.mxu0 %vm81_vm1, %v69_v44  ;;  %933 = vtanh.f32 %v149_v49  ;;  %v808_v44 = vld [vmem:[%s1408_s5 + $0x28] sm:$0xff] }
  0x97   :  { %347 = vmatmul.bf16.vlgmr.msra.gmra.mxu1 %v255_v48  ;;  %546 = vmatpush.bf16.msra.mxu2 %v808_v44 }
  0x98   :  { %917 = vmatpush.bf16.msra.mxu3 %v808_v44  ;;  %v208_v44 = vpop.f32.mrf.mxu3 }
  0x9b   :  { %v150_v50 = vpop.f32.mrf.mxu0  ;;  %547 = vmatpush.bf16.msra.mxu2 %v807_v47 }
  0x9c   :  { %v151_v51 = vadd.f32 %v1218_v38, %v150_v50  ;;  %v934_v55 = vpop.eup %933  ;;  %918 = vmatpush.bf16.msra.mxu3 %v807_v47  ;;  %v806_v50 = vld [vmem:[%s1408_s5 + $0x18] sm:$0xff] }
  0x9e   :  { %935 = vtanh.f32 %v151_v51 }
  0x9f   :  { %548 = vmatpush.bf16.msra.mxu2 %v806_v50 }
  0xa0   :  { %919 = vmatpush.bf16.msra.mxu3 %v806_v50 }
  0xa3   :  { %v153_v56 = vpop.f32.mrf.mxu0  ;;  %549 = vmatpush.bf16.msra.mxu2 %v805_v53 }
  0xa4   :  { %v936_v57 = vpop.eup %935  ;;  %v154_v62 = vadd.f32 %v1218_v38, %v153_v56  ;;  %920 = vmatpush.bf16.msra.mxu3 %v805_v53 }
  0xa5   :  { %v256_v58 = vpack.c.bf16 %v936_v57, %v934_v55  ;;  %v804_v55 = vld [vmem:[%s1408_s5 + $0x8] sm:$0xff] }
  0xa6   :  { %725 = vmatmul.msk.bf16.gmra.mxu0 %vm81_vm1, %v70_v54  ;;  %937 = vtanh.f32 %v154_v62 }
  0xa7   :  { %352 = vmatmul.bf16.gmra.mxu1 %v256_v58  ;;  %550 = vmatpush.bf16.msra.mxu2 %v804_v55  ;;  %v803_v58 = vld [vmem:[%s1408_s5] sm:$0xff] }
  0xa8   :  { %921 = vmatpush.bf16.msra.mxu3 %v804_v55 }
  0xab   :  { %v155_v63 = vpop.f32.mrf.mxu0  ;;  %551 = vmatpush.bf16.msra.mxu2 %v803_v58 }
  0xac   :  { %v156_v0 = vadd.f32 %v1218_v38, %v155_v63  ;;  %v938_v4 = vpop.eup %937  ;;  %922 = vmatpush.bf16.msra.mxu3 %v803_v58 }
  0xae   :  { %939 = vtanh.f32 %v156_v0 }
  0xb3   :  { %v158_v5 = vpop.f32.mrf.mxu0 }
  0xb4   :  { %v940_v6 = vpop.eup %939  ;;  %v159_v11 = vadd.f32 %v1218_v38, %v158_v5 }
  0xb5   :  { %v257_v7 = vpack.c.bf16 %v940_v6, %v938_v4  ;;  %v1315_v4 = vld [vmem:[%s1407_s4] ss:$0 sm:$0xff] }
  0xb6   :  { %726 = vmatmul.msk.bf16.gmra.mxu0 %vm81_vm1, %v71_v3  ;;  %941 = vtanh.f32 %v159_v11 }
  0xb7   :  { %357 = vmatmul.bf16.gmra.mxu1 %v257_v7 }
  0xbb   :  { %v160_v12 = vpop.f32.mrf.mxu0 }
  0xbc   :  { %v161_v13 = vadd.f32 %v1218_v38, %v160_v12  ;;  %v942_v17 = vpop.eup %941 }
  0xbe   :  { %943 = vtanh.f32 %v161_v13 }
  0xc3   :  { %v163_v18 = vpop.f32.mrf.mxu0 }
  0xc4   :  { %v944_v19 = vpop.eup %943  ;;  %v164_v24 = vadd.f32 %v1218_v38, %v163_v18 }
  0xc5   :  { %v258_v20 = vpack.c.bf16 %v944_v19, %v942_v17 }
  0xc6   :  { %727 = vmatmul.msk.bf16.gmra.mxu0 %vm81_vm1, %v72_v16  ;;  %945 = vtanh.f32 %v164_v24 }
  0xc7   :  { %362 = vmatmul.bf16.gmra.mxu1 %v258_v20 }
  0xcb   :  { %v165_v25 = vpop.f32.mrf.mxu0 }
  0xcc   :  { %v166_v26 = vadd.f32 %v1218_v38, %v165_v25  ;;  %v946_v27 = vpop.eup %945 }
  0xce   :  { %947 = vtanh.f32 %v166_v26 }
  0xd3   :  { %v168_v28 = vpop.f32.mrf.mxu0 }
  0xd4   :  { %v948_v29 = vpop.eup %947  ;;  %v169_v31 = vadd.f32 %v1218_v38, %v168_v28 }
  0xd5   :  { %v259_v30 = vpack.c.bf16 %v948_v29, %v946_v27 }
  0xd6   :  { %949 = vtanh.f32 %v169_v31 }
  0xd7   :  { %367 = vmatmul.bf16.gmra.mxu1 %v259_v30 }
  0xdb   :  { %v170_v32 = vpop.f32.mrf.mxu0 }
  0xdc   :  { %v171_v33 = vadd.f32 %v1218_v38, %v170_v32  ;;  %v950_v34 = vpop.eup %949 }
  0xde   :  { %951 = vtanh.f32 %v171_v33 }
  0xe3   :  { %v173_v35 = vpop.f32.mrf.mxu0 }
  0xe4   :  { %v952_v36 = vpop.eup %951  ;;  %v174_v40 = vadd.f32 %v1218_v38, %v173_v35 }
  0xe5   :  { %v260_v37 = vpack.c.bf16 %v952_v36, %v950_v34 }
  0xe6   :  { %953 = vtanh.f32 %v174_v40 }
  0xe7   :  { %372 = vmatmul.bf16.gmra.mxu1 %v260_v37 }
  0xeb   :  { %v175_v41 = vpop.f32.mrf.mxu0 }
  0xec   :  { %v176_v43 = vadd.f32 %v1218_v38, %v175_v41  ;;  %v954_v45 = vpop.eup %953 }
  0xee   :  { %955 = vtanh.f32 %v176_v43 }
  0xf3   :  { %v178_v46 = vpop.f32.mrf.mxu0 }
  0xf4   :  { %v956_v48 = vpop.eup %955  ;;  %v179_v51 = vadd.f32 %v1218_v38, %v178_v46 }
  0xf5   :  { %v261_v49 = vpack.c.bf16 %v956_v48, %v954_v45 }
  0xf6   :  { %957 = vtanh.f32 %v179_v51 }
  0xf7   :  { %377 = vmatmul.bf16.gmra.mxu1 %v261_v49 }
  0xfb   :  { %v180_v52 = vpop.f32.mrf.mxu0 }
  0xfc   :  { %v181_v54 = vadd.f32 %v1218_v38, %v180_v52  ;;  %v958_v56 = vpop.eup %957 }
  0xfe   :  { %959 = vtanh.f32 %v181_v54 }
 0x103   :  { %v183_v57 = vpop.f32.mrf.mxu0 }
 0x104   :  { %v960_v59 = vpop.eup %959  ;;  %v184_v61 = vadd.f32 %v1218_v38, %v183_v57 }
 0x105   :  { %v262_v60 = vpack.c.bf16 %v960_v59, %v958_v56  ;;  %v210_v56 = vpop.f32.mrf.mxu3 }
 0x106   :  { %961 = vtanh.f32 %v184_v61 }
 0x107   :  { %382 = vmatmul.bf16.gmra.mxu1 %v262_v60 }
 0x10b   :  { %v185_v62 = vpop.f32.mrf.mxu0 }
 0x10c   :  { %v186_v63 = vadd.f32 %v1218_v38, %v185_v62  ;;  %v962_v0 = vpop.eup %961 }
 0x10e   :  { %963 = vtanh.f32 %v186_v63 }
 0x113   :  { %v188_v1 = vpop.f32.mrf.mxu0 }
 0x114   :  { %v964_v2 = vpop.eup %963  ;;  %v348_v3 = vpop.f32.mrf.mxu1  ;;  %v189_v6 = vadd.f32 %v1218_v38, %v188_v1 }
 0x115   :  { %v263_v5 = vpack.c.bf16 %v964_v2, %v962_v0  ;;  %v349_v7 = vadd.f32 %v1315_v4, %v348_v3  ;;  %v209_v0 = vadd.f32 %v1218_v38, %v208_v44  ;;  %v213_v1 = vpop.f32.mrf.mxu3  ;;  %v211_v2 = vadd.f32 %v1218_v38, %v210_v56 }
 0x116   :  { %965 = vtanh.f32 %v189_v6 }
 0x117   :  { %387 = vmatmul.bf16.gmra.mxu1 %v263_v5  ;;  %967 = vtanh.f32 %v349_v7 }
 0x11b   :  { %v190_v8 = vpop.f32.mrf.mxu0 }
 0x11c   :  { %v191_v9 = vadd.f32 %v1218_v38, %v190_v8  ;;  %v350_v10 = vpop.f32.mrf.mxu1  ;;  %v966_v12 = vpop.eup %965 }
 0x11d   :  { %v351_v11 = vadd.f32 %v1315_v4, %v350_v10  ;;  %v968_v13 = vpop.eup %967  ;;  %v215_v8 = vpop.f32.mrf.mxu3 }
 0x11e   :  { %969 = vtanh.f32 %v191_v9 }
 0x11f   :  { %971 = vtanh.f32 %v351_v11 }
 0x123   :  { %v193_v14 = vpop.f32.mrf.mxu0 }
 0x124   :  { %v970_v15 = vpop.eup %969  ;;  %v353_v16 = vpop.f32.mrf.mxu1  ;;  %v194_v20 = vadd.f32 %v1218_v38, %v193_v14 }
 0x125   :  { %v972_v17 = vpop.eup %971  ;;  %v264_v18 = vpack.c.bf16 %v970_v15, %v966_v12  ;;  %v354_v21 = vadd.f32 %v1315_v4, %v353_v16  ;;  %v214_v15 = vadd.f32 %v1218_v38, %v213_v1  ;;  %v216_v16 = vadd.f32 %v1218_v38, %v215_v8 }
 0x126   :  { %v460_v19 = vpack.c.bf16 %v972_v17, %v968_v13  ;;  %973 = vtanh.f32 %v194_v20 }
 0x127   :  { %392 = vmatmul.bf16.gmra.mxu1 %v264_v18  ;;  %975 = vtanh.f32 %v354_v21  ;;  %v218_v18 = vpop.f32.mrf.mxu3 }
 0x128   :  { %552 = vmatmul.bf16.vlgmr.msra.gmra.mxu2 %v460_v19 }
 0x12b   :  { %v195_v22 = vpop.f32.mrf.mxu0 }
 0x12c   :  { %v196_v23 = vadd.f32 %v1218_v38, %v195_v22  ;;  %v355_v24 = vpop.f32.mrf.mxu1  ;;  %v974_v26 = vpop.eup %973 }
 0x12d   :  { %v356_v25 = vadd.f32 %v1315_v4, %v355_v24  ;;  %v976_v27 = vpop.eup %975 }
 0x12e   :  { %977 = vtanh.f32 %v196_v23 }
 0x12f   :  { %979 = vtanh.f32 %v356_v25 }
 0x133   :  { %v198_v28 = vpop.f32.mrf.mxu0 }
 0x134   :  { %v978_v29 = vpop.eup %977  ;;  %v358_v30 = vpop.f32.mrf.mxu1  ;;  %v199_v34 = vadd.f32 %v1218_v38, %v198_v28 }
 0x135   :  { %v980_v31 = vpop.eup %979  ;;  %v265_v32 = vpack.c.bf16 %v978_v29, %v974_v26  ;;  %v359_v35 = vadd.f32 %v1315_v4, %v358_v30  ;;  %v220_v26 = vpop.f32.mrf.mxu3  ;;  %v219_v29 = vadd.f32 %v1218_v38, %v218_v18 }
 0x136   :  { %v461_v33 = vpack.c.bf16 %v980_v31, %v976_v27  ;;  %981 = vtanh.f32 %v199_v34  ;;  %v221_v30 = vadd.f32 %v1218_v38, %v220_v26 }
 0x137   :  { %397 = vmatmul.bf16.gmra.mxu1 %v265_v32  ;;  %983 = vtanh.f32 %v359_v35 }
 0x138   :  { %557 = vmatmul.bf16.gmra.mxu2 %v461_v33 }
 0x13b   :  { %v200_v36 = vpop.f32.mrf.mxu0 }
 0x13c   :  { %v201_v37 = vadd.f32 %v1218_v38, %v200_v36  ;;  %v360_v39 = vpop.f32.mrf.mxu1  ;;  %v982_v41 = vpop.eup %981 }
 0x13d   :  { %v361_v40 = vadd.f32 %v1315_v4, %v360_v39  ;;  %v984_v42 = vpop.eup %983 }
 0x13e   :  { %985 = vtanh.f32 %v201_v37 }
 0x13f   :  { %987 = vtanh.f32 %v361_v40 }
 0x143   :  { %v203_v43 = vpop.f32.mrf.mxu0 }
 0x144   :  { %v986_v45 = vpop.eup %985  ;;  %v363_v46 = vpop.f32.mrf.mxu1  ;;  %v204_v50 = vadd.f32 %v1218_v38, %v203_v43 }
 0x145   :  { %v988_v47 = vpop.eup %987  ;;  %v266_v48 = vpack.c.bf16 %v986_v45, %v982_v41  ;;  %v364_v51 = vadd.f32 %v1315_v4, %v363_v46 }
 0x146   :  { %v462_v49 = vpack.c.bf16 %v988_v47, %v984_v42  ;;  %989 = vtanh.f32 %v204_v50 }
 0x147   :  { %402 = vmatmul.bf16.gmra.mxu1 %v266_v48  ;;  %991 = vtanh.f32 %v364_v51 }
 0x148   :  { %562 = vmatmul.bf16.gmra.mxu2 %v462_v49 }
 0x14b   :  { %v205_v52 = vpop.f32.mrf.mxu0 }
 0x14c   :  { %v206_v53 = vadd.f32 %v1218_v38, %v205_v52  ;;  %v365_v54 = vpop.f32.mrf.mxu1  ;;  %v990_v57 = vpop.eup %989 }
 0x14d   :  { %v366_v55 = vadd.f32 %v1315_v4, %v365_v54  ;;  %v992_v58 = vpop.eup %991 }
 0x14e   :  { %993 = vtanh.f32 %v206_v53 }
 0x14f   :  { %995 = vtanh.f32 %v366_v55 }
 0x150   :  { %997 = vtanh.f32 %v209_v0 }
 0x151   :  { %999 = vtanh.f32 %v211_v2 }
 0x154   :  { %v994_v59 = vpop.eup %993  ;;  %v368_v60 = vpop.f32.mrf.mxu1 }
 0x155   :  { %v996_v61 = vpop.eup %995  ;;  %v267_v62 = vpack.c.bf16 %v994_v59, %v990_v57  ;;  %v369_v3 = vadd.f32 %v1315_v4, %v368_v60  ;;  %v1354_v59 = vld [vmem:[%s1409_s6] ss:$0 sm:$0xff]  ;;  %s1083_s6 = smov [#allocation2]  }
 0x156   :  { %v463_v63 = vpack.c.bf16 %v996_v61, %v992_v58  ;;  %v998_v7 = vpop.eup %997  ;;  %s701_s25 = sshll.u32 %s1083_s6, 4  ;;  %s702_s25 = int_to_ptr.vmem [resolvable:$true] %s701_s25 }
 0x157   :  { %407 = vmatmul.bf16.vlgmr.msrb.gmra.mxu3 %v267_v62  ;;  %1001 = vtanh.f32 %v369_v3  ;;  %v1000_v9 = vpop.eup %999 }
 0x158   :  { %567 = vmatmul.bf16.gmra.mxu2 %v463_v63  ;;  %v268_v13 = vpack.c.bf16 %v1000_v9, %v998_v7 }
 0x15c   :  { %v370_v5 = vpop.f32.mrf.mxu1 }
 0x15d   :  { %v371_v6 = vadd.f32 %v1315_v4, %v370_v5  ;;  %v1002_v10 = vpop.eup %1001 }
 0x15f   :  { %1003 = vtanh.f32 %v371_v6 }
 0x160   :  { %1005 = vtanh.f32 %v214_v15 }
 0x161   :  { %1007 = vtanh.f32 %v216_v16 }
 0x164   :  { %v373_v11 = vpop.f32.mrf.mxu1 }
 0x165   :  { %v1004_v12 = vpop.eup %1003  ;;  %v374_v17 = vadd.f32 %v1315_v4, %v373_v11 }
 0x166   :  { %v464_v14 = vpack.c.bf16 %v1004_v12, %v1002_v10  ;;  %v1006_v21 = vpop.eup %1005 }
 0x167   :  { %412 = vmatmul.bf16.gmra.mxu3 %v268_v13  ;;  %1009 = vtanh.f32 %v374_v17  ;;  %v1008_v22 = vpop.eup %1007 }
 0x168   :  { %572 = vmatmul.bf16.gmra.mxu2 %v464_v14  ;;  %v269_v27 = vpack.c.bf16 %v1008_v22, %v1006_v21 }
 0x16c   :  { %v375_v19 = vpop.f32.mrf.mxu1 }
 0x16d   :  { %v376_v20 = vadd.f32 %v1315_v4, %v375_v19  ;;  %v1010_v23 = vpop.eup %1009 }
 0x16f   :  { %1011 = vtanh.f32 %v376_v20 }
 0x170   :  { %1013 = vtanh.f32 %v219_v29 }
 0x171   :  { %1015 = vtanh.f32 %v221_v30 }
 0x174   :  { %v378_v24 = vpop.f32.mrf.mxu1 }
 0x175   :  { %v1012_v25 = vpop.eup %1011  ;;  %v379_v31 = vadd.f32 %v1315_v4, %v378_v24 }
 0x176   :  { %v465_v28 = vpack.c.bf16 %v1012_v25, %v1010_v23  ;;  %v1014_v34 = vpop.eup %1013 }
 0x177   :  { %417 = vmatmul.bf16.gmra.mxu3 %v269_v27  ;;  %1017 = vtanh.f32 %v379_v31  ;;  %v1016_v35 = vpop.eup %1015 }
 0x178   :  { %577 = vmatmul.bf16.gmra.mxu2 %v465_v28  ;;  %v270_v40 = vpack.c.bf16 %v1016_v35, %v1014_v34 }
 0x17c   :  { %v380_v32 = vpop.f32.mrf.mxu1 }
 0x17d   :  { %v381_v33 = vadd.f32 %v1315_v4, %v380_v32  ;;  %v1018_v36 = vpop.eup %1017 }
 0x17f   :  { %1019 = vtanh.f32 %v381_v33 }
 0x184   :  { %v383_v37 = vpop.f32.mrf.mxu1 }
 0x185   :  { %v1020_v39 = vpop.eup %1019  ;;  %v384_v38 = vadd.f32 %v1315_v4, %v383_v37 }
 0x186   :  { %v466_v41 = vpack.c.bf16 %v1020_v39, %v1018_v36 }
 0x187   :  { %422 = vmatmul.bf16.gmra.mxu3 %v270_v40  ;;  %1021 = vtanh.f32 %v384_v38 }
 0x188   :  { %582 = vmatmul.bf16.gmra.mxu2 %v466_v41 }
 0x18c   :  { %v385_v42 = vpop.f32.mrf.mxu1 }
 0x18d   :  { %v386_v43 = vadd.f32 %v1315_v4, %v385_v42  ;;  %v1022_v44 = vpop.eup %1021 }
 0x18f   :  { %1023 = vtanh.f32 %v386_v43 }
 0x194   :  { %v388_v45 = vpop.f32.mrf.mxu1 }
 0x195   :  { %v1024_v46 = vpop.eup %1023  ;;  %v389_v48 = vadd.f32 %v1315_v4, %v388_v45 }
 0x196   :  { %v467_v47 = vpack.c.bf16 %v1024_v46, %v1022_v44 }
 0x197   :  { %1025 = vtanh.f32 %v389_v48 }
 0x198   :  { %587 = vmatmul.bf16.gmra.mxu2 %v467_v47 }
 0x19c   :  { %v390_v49 = vpop.f32.mrf.mxu1 }
 0x19d   :  { %v391_v50 = vadd.f32 %v1315_v4, %v390_v49  ;;  %v1026_v51 = vpop.eup %1025 }
 0x19f   :  { %1027 = vtanh.f32 %v391_v50 }
 0x1a4   :  { %v393_v52 = vpop.f32.mrf.mxu1 }
 0x1a5   :  { %v1028_v53 = vpop.eup %1027  ;;  %v394_v55 = vadd.f32 %v1315_v4, %v393_v52 }
 0x1a6   :  { %v468_v54 = vpack.c.bf16 %v1028_v53, %v1026_v51 }
 0x1a7   :  { %1029 = vtanh.f32 %v394_v55 }
 0x1a8   :  { %592 = vmatmul.bf16.gmra.mxu2 %v468_v54 }
 0x1ab   :  { %v553_v56 = vpop.f32.mrf.mxu2 }
 0x1ac   :  { %v395_v57 = vpop.f32.mrf.mxu1  ;;  %v554_v62 = vadd.f32 %v1354_v59, %v553_v56 }
 0x1ad   :  { %v396_v58 = vadd.f32 %v1315_v4, %v395_v57  ;;  %v1030_v61 = vpop.eup %1029 }
 0x1af   :  { %1031 = vtanh.f32 %v396_v58 }
 0x1b3   :  { %v555_v60 = vpop.f32.mrf.mxu2 }
 0x1b4   :  { %v556_v63 = vadd.f32 %v1354_v59, %v555_v60  ;;  %v398_v0 = vpop.f32.mrf.mxu1 }
 0x1b5   :  { %v1032_v1 = vpop.eup %1031  ;;  %v399_v5 = vadd.f32 %v1315_v4, %v398_v0 }
 0x1b6   :  { %v814_v2 = vpack.c.bf16 %v556_v63, %v554_v62  ;;  %v469_v3 = vpack.c.bf16 %v1032_v1, %v1030_v61 }
 0x1b7   :  { %1033 = vtanh.f32 %v399_v5 }
 0x1b8   :  { %815 = vst [vmem:[#allocation2] sm:$0xff] %v814_v2   ;;  %597 = vmatmul.bf16.gmra.mxu2 %v469_v3 }
 0x1bb   :  { %v558_v6 = vpop.f32.mrf.mxu2 }
 0x1bc   :  { %v400_v7 = vpop.f32.mrf.mxu1  ;;  %v559_v11 = vadd.f32 %v1354_v59, %v558_v6 }
 0x1bd   :  { %v401_v8 = vadd.f32 %v1315_v4, %v400_v7  ;;  %v1034_v10 = vpop.eup %1033 }
 0x1bf   :  { %1035 = vtanh.f32 %v401_v8 }
 0x1c3   :  { %v560_v9 = vpop.f32.mrf.mxu2 }
 0x1c4   :  { %v561_v12 = vadd.f32 %v1354_v59, %v560_v9  ;;  %v403_v13 = vpop.f32.mrf.mxu1 }
 0x1c5   :  { %v1036_v14 = vpop.eup %1035  ;;  %v404_v17 = vadd.f32 %v1315_v4, %v403_v13 }
 0x1c6   :  { %v819_v15 = vpack.c.bf16 %v561_v12, %v559_v11  ;;  %v470_v16 = vpack.c.bf16 %v1036_v14, %v1034_v10 }
 0x1c7   :  { %1037 = vtanh.f32 %v404_v17 }
 0x1c8   :  { %891 = vst [vmem:[#allocation2 + $0x8] sm:$0xff] %v819_v15   ;;  %602 = vmatmul.bf16.gmra.mxu2 %v470_v16 }
 0x1cb   :  { %v563_v18 = vpop.f32.mrf.mxu2 }
 0x1cc   :  { %v405_v19 = vpop.f32.mrf.mxu1  ;;  %v564_v23 = vadd.f32 %v1354_v59, %v563_v18 }
 0x1cd   :  { %v406_v20 = vadd.f32 %v1315_v4, %v405_v19  ;;  %v1038_v22 = vpop.eup %1037 }
 0x1cf   :  { %1039 = vtanh.f32 %v406_v20 }
 0x1d3   :  { %v565_v21 = vpop.f32.mrf.mxu2 }
 0x1d4   :  { %v566_v24 = vadd.f32 %v1354_v59, %v565_v21 }
 0x1d5   :  { %v1040_v25 = vpop.eup %1039 }
 0x1d6   :  { %v824_v26 = vpack.c.bf16 %v566_v24, %v564_v23  ;;  %v471_v27 = vpack.c.bf16 %v1040_v25, %v1038_v22 }
 0x1d8   :  { %892 = vst [vmem:[#allocation2 + $0x10] sm:$0xff] %v824_v26   ;;  %607 = vmatmul.bf16.gmra.mxu2 %v471_v27 }
 0x1da   :  { %v408_v28 = vpop.f32.mrf.mxu3 }
 0x1db   :  { %v568_v29 = vpop.f32.mrf.mxu2  ;;  %v409_v30 = vadd.f32 %v1315_v4, %v408_v28 }
 0x1dc   :  { %v569_v34 = vadd.f32 %v1354_v59, %v568_v29 }
 0x1dd   :  { %1041 = vtanh.f32 %v409_v30 }
 0x1e2   :  { %v410_v31 = vpop.f32.mrf.mxu3 }
 0x1e3   :  { %v411_v32 = vadd.f32 %v1315_v4, %v410_v31  ;;  %v570_v33 = vpop.f32.mrf.mxu2  ;;  %v1042_v37 = vpop.eup %1041 }
 0x1e4   :  { %v571_v35 = vadd.f32 %v1354_v59, %v570_v33 }
 0x1e5   :  { %1043 = vtanh.f32 %v411_v32 }
 0x1e6   :  { %v829_v36 = vpack.c.bf16 %v571_v35, %v569_v34 }
 0x1e8   :  { %893 = vst [vmem:[#allocation2 + $0x18] sm:$0xff] %v829_v36  }
 0x1ea   :  { %v413_v39 = vpop.f32.mrf.mxu3 }
 0x1eb   :  { %v1044_v40 = vpop.eup %1043  ;;  %v573_v41 = vpop.f32.mrf.mxu2  ;;  %v414_v42 = vadd.f32 %v1315_v4, %v413_v39 }
 0x1ec   :  { %v472_v38 = vpack.c.bf16 %v1044_v40, %v1042_v37  ;;  %v574_v46 = vadd.f32 %v1354_v59, %v573_v41 }
 0x1ed   :  { %1045 = vtanh.f32 %v414_v42 }
 0x1ee   :  { %612 = vmatmul.bf16.vlgmr.msra.gmra.mxu3 %v472_v38 }
 0x1f2   :  { %v415_v43 = vpop.f32.mrf.mxu3 }
 0x1f3   :  { %v416_v44 = vadd.f32 %v1315_v4, %v415_v43  ;;  %v575_v45 = vpop.f32.mrf.mxu2  ;;  %v1046_v49 = vpop.eup %1045 }
 0x1f4   :  { %v576_v47 = vadd.f32 %v1354_v59, %v575_v45 }
 0x1f5   :  { %1047 = vtanh.f32 %v416_v44 }
 0x1f6   :  { %v834_v48 = vpack.c.bf16 %v576_v47, %v574_v46 }
 0x1f8   :  { %894 = vst [vmem:[#allocation2 + $0x20] sm:$0xff] %v834_v48  }
 0x1fa   :  { %v418_v50 = vpop.f32.mrf.mxu3 }
 0x1fb   :  { %v1048_v51 = vpop.eup %1047  ;;  %v578_v52 = vpop.f32.mrf.mxu2  ;;  %v419_v54 = vadd.f32 %v1315_v4, %v418_v50 }
 0x1fc   :  { %v473_v53 = vpack.c.bf16 %v1048_v51, %v1046_v49  ;;  %v579_v58 = vadd.f32 %v1354_v59, %v578_v52 }
 0x1fd   :  { %1049 = vtanh.f32 %v419_v54 }
 0x1fe   :  { %617 = vmatmul.bf16.gmra.mxu3 %v473_v53 }
 0x202   :  { %v420_v55 = vpop.f32.mrf.mxu3 }
 0x203   :  { %v421_v56 = vadd.f32 %v1315_v4, %v420_v55  ;;  %v580_v57 = vpop.f32.mrf.mxu2  ;;  %v1050_v62 = vpop.eup %1049 }
 0x204   :  { %v581_v60 = vadd.f32 %v1354_v59, %v580_v57 }
 0x205   :  { %1051 = vtanh.f32 %v421_v56 }
 0x206   :  { %v839_v61 = vpack.c.bf16 %v581_v60, %v579_v58 }
 0x208   :  { %895 = vst [vmem:[#allocation2 + $0x28] sm:$0xff] %v839_v61  }
 0x20a   :  { %v423_v63 = vpop.f32.mrf.mxu3 }
 0x20b   :  { %v1052_v0 = vpop.eup %1051  ;;  %v583_v1 = vpop.f32.mrf.mxu2  ;;  %v424_v3 = vadd.f32 %v1315_v4, %v423_v63 }
 0x20c   :  { %v474_v2 = vpack.c.bf16 %v1052_v0, %v1050_v62  ;;  %v584_v8 = vadd.f32 %v1354_v59, %v583_v1 }
 0x20d   :  { %1053 = vtanh.f32 %v424_v3 }
 0x20e   :  { %622 = vmatmul.bf16.gmra.mxu3 %v474_v2 }
 0x212   :  { %v425_v5 = vpop.f32.mrf.mxu3 }
 0x213   :  { %v426_v6 = vadd.f32 %v1315_v4, %v425_v5  ;;  %v585_v7 = vpop.f32.mrf.mxu2  ;;  %v1054_v11 = vpop.eup %1053 }
 0x214   :  { %v586_v9 = vadd.f32 %v1354_v59, %v585_v7 }
 0x215   :  { %1055 = vtanh.f32 %v426_v6 }
 0x216   :  { %v844_v10 = vpack.c.bf16 %v586_v9, %v584_v8 }
 0x218   :  { %896 = vst [vmem:[#allocation2 + $0x30] sm:$0xff] %v844_v10  }
 0x21b   :  { %v1056_v12 = vpop.eup %1055  ;;  %v588_v13 = vpop.f32.mrf.mxu2 }
 0x21c   :  { %v475_v14 = vpack.c.bf16 %v1056_v12, %v1054_v11  ;;  %v589_v16 = vadd.f32 %v1354_v59, %v588_v13 }
 0x21e   :  { %627 = vmatmul.bf16.gmra.mxu3 %v475_v14 }
 0x223   :  { %v590_v15 = vpop.f32.mrf.mxu2 }
 0x224   :  { %v591_v17 = vadd.f32 %v1354_v59, %v590_v15 }
 0x226   :  { %v849_v4 = vpack.c.bf16 %v591_v17, %v589_v16 }
 0x228   :  { %897 = vst [vmem:[#allocation2 + $0x38] sm:$0xff] %v849_v4  }
 0x22b   :  { %v593_v18 = vpop.f32.mrf.mxu2 }
 0x22c   :  { %v594_v20 = vadd.f32 %v1354_v59, %v593_v18 }
 0x233   :  { %v595_v19 = vpop.f32.mrf.mxu2 }
 0x234   :  { %v596_v21 = vadd.f32 %v1354_v59, %v595_v19 }
 0x236   :  { %v854_v22 = vpack.c.bf16 %v596_v21, %v594_v20 }
 0x238   :  { %898 = vst [vmem:[#allocation2 + $0x40] sm:$0xff] %v854_v22  }
 0x23b   :  { %v598_v23 = vpop.f32.mrf.mxu2 }
 0x23c   :  { %v599_v25 = vadd.f32 %v1354_v59, %v598_v23 }
 0x243   :  { %v600_v24 = vpop.f32.mrf.mxu2 }
 0x244   :  { %v601_v26 = vadd.f32 %v1354_v59, %v600_v24 }
 0x246   :  { %v859_v27 = vpack.c.bf16 %v601_v26, %v599_v25 }
 0x248   :  { %899 = vst [vmem:[#allocation2 + $0x48] sm:$0xff] %v859_v27  }
 0x24b   :  { %v603_v28 = vpop.f32.mrf.mxu2 }
 0x24c   :  { %v604_v30 = vadd.f32 %v1354_v59, %v603_v28 }
 0x253   :  { %v605_v29 = vpop.f32.mrf.mxu2 }
 0x254   :  { %v606_v31 = vadd.f32 %v1354_v59, %v605_v29 }
 0x256   :  { %v864_v32 = vpack.c.bf16 %v606_v31, %v604_v30 }
 0x258   :  { %900 = vst [vmem:[#allocation2 + $0x50] sm:$0xff] %v864_v32  }
 0x25b   :  { %v608_v33 = vpop.f32.mrf.mxu2 }
 0x25c   :  { %v609_v35 = vadd.f32 %v1354_v59, %v608_v33 }
 0x263   :  { %v610_v34 = vpop.f32.mrf.mxu2 }
 0x264   :  { %v611_v36 = vadd.f32 %v1354_v59, %v610_v34 }
 0x266   :  { %v869_v37 = vpack.c.bf16 %v611_v36, %v609_v35 }
 0x268   :  { %901 = vst [vmem:[#allocation2 + $0x58] sm:$0xff] %v869_v37  }
 0x271   :  { %v613_v39 = vpop.f32.mrf.mxu3 }
 0x272   :  { %v614_v41 = vadd.f32 %v1354_v59, %v613_v39 }
 0x279   :  { %v615_v40 = vpop.f32.mrf.mxu3 }
 0x27a   :  { %v616_v38 = vadd.f32 %v1354_v59, %v615_v40 }
 0x27c   :  { %v874_v42 = vpack.c.bf16 %v616_v38, %v614_v41 }
 0x27e   :  { %902 = vst [vmem:[#allocation2 + $0x60] sm:$0xff] %v874_v42  }
 0x281   :  { %v618_v43 = vpop.f32.mrf.mxu3 }
 0x282   :  { %v619_v45 = vadd.f32 %v1354_v59, %v618_v43 }
 0x289   :  { %v620_v44 = vpop.f32.mrf.mxu3 }
 0x28a   :  { %v621_v46 = vadd.f32 %v1354_v59, %v620_v44 }
 0x28c   :  { %v879_v47 = vpack.c.bf16 %v621_v46, %v619_v45 }
 0x28e   :  { %903 = vst [vmem:[#allocation2 + $0x68] sm:$0xff] %v879_v47  }
 0x291   :  { %v623_v48 = vpop.f32.mrf.mxu3 }
 0x292   :  { %v624_v50 = vadd.f32 %v1354_v59, %v623_v48 }
 0x299   :  { %v625_v49 = vpop.f32.mrf.mxu3 }
 0x29a   :  { %v626_v51 = vadd.f32 %v1354_v59, %v625_v49 }
 0x29c   :  { %v884_v52 = vpack.c.bf16 %v626_v51, %v624_v50 }
 0x29e   :  { %904 = vst [vmem:[#allocation2 + $0x70] sm:$0xff] %v884_v52  }
 0x2a1   :  { %v628_v53 = vpop.f32.mrf.mxu3 }
 0x2a2   :  { %v629_v55 = vadd.f32 %v1354_v59, %v628_v53 }
 0x2a9   :  { %v630_v54 = vpop.f32.mrf.mxu3 }
 0x2aa   :  { %v631_v56 = vadd.f32 %v1354_v59, %v630_v54 }
 0x2ac   :  { %v889_v57 = vpack.c.bf16 %v631_v56, %v629_v55 }
 0x2ae   :  { %905 = vst [vmem:[#allocation2 + $0x78] sm:$0xff] %v889_v57  }
 0x2af   :  { %709 = dma.vmem_to_hbm [thread:$0]  %s702_s25, 2048, %s704_s28, [#allocation3], %s1084_s29, %s1084_s29, %s1085_s30  }
 0x2b0   :  { %1081 = dma.done.wait [#allocation3], 2048  }
 0x2b1   :  { %1082 = vsyncadd [#allocation3], 4294965248 }
 0x2b2   :  { %714 = vsyncpa [#allocation3], 1 }

</bundles_post_ra>
